<compile_context>
chip_gen: v7x
topology: tpu7x:2x2x1
jax: 0.10.0
libtpu: 0.0.40
codegen_flags: <defaults>
</compile_context>

<pallas_src>
import jax
import jax.numpy as jnp
from jax import lax
from jax.experimental import pallas as pl
from jax.experimental.pallas import tpu as pltpu


# ----------------------------------------------------------------------------
# Fused Pallas kernel: Conv3x3+ReLU -> MaxPool2x2 -> Linear+ReLU -> Linear+Sigmoid
# ----------------------------------------------------------------------------
def eye_fused_kernel(patches_ref, wc_ref, bc_ref, w1r_ref, b1_ref, w2_ref,
                     b2_ref, o_ref):
    # patches_ref: (4*N*Hp*Wp, 9*Cin) im2col, rows ordered (g, n, hh, ww)
    # wc_ref     : (9*Cin, Cout)      conv weight, cols match patch columns
    # bc_ref     : (1, Cout)
    # w1r_ref    : (Cout, N*Hp*Wp, H1)  Linear1 weight with NCHW-flatten folded in
    # b1_ref     : (1, H1)
    # w2_ref     : (H1, Out), b2_ref: (1, Out)
    # o_ref      : (N, Out)

    # --- Conv2d(4,8,3,pad=1) + ReLU: a single im2col matmul on the MXU -------
    conv = jnp.dot(patches_ref[...], wc_ref[...],
                   preferred_element_type=jnp.float32)          # (512, 8)
    conv = jnp.maximum(conv + bc_ref[...], 0.0)

    # --- MaxPool2d(2): max over the four contiguous pool-offset row blocks ---
    mp = conv.shape[0] // 4                                     # N*Hp*Wp = 128
    pooled = jnp.maximum(jnp.maximum(conv[0:mp],        conv[mp:2 * mp]),
                         jnp.maximum(conv[2 * mp:3 * mp], conv[3 * mp:4 * mp]))

    # --- Linear(512,32) with the NCHW flatten folded into w1r ---------------
    # e[r, j] = sum_c pooled[r, c] * w1r[c, r, j]   (r = n*Hp*Wp + hh*Wp + ww)
    cout = w1r_ref.shape[0]
    e = pooled[:, 0:1] * w1r_ref[0]
    for c in range(1, cout):                                    # static unroll (8)
        e = e + pooled[:, c:c + 1] * w1r_ref[c]                 # (128, 32)

    n = o_ref.shape[0]
    h = jnp.sum(e.reshape(n, mp // n, e.shape[-1]), axis=1)     # (N, 32) per-sample sum
    h = jnp.maximum(h + b1_ref[...], 0.0)                       # ReLU

    # --- Linear(32,2) + Sigmoid ----------------------------------------------
    z = jnp.dot(h, w2_ref[...], preferred_element_type=jnp.float32) + b2_ref[...]
    o_ref[...] = jax.nn.sigmoid(z)                              # (N, 2)


# ----------------------------------------------------------------------------
# Wrapper: trace-time layout glue (cheap XLA) + one pallas_call
# ----------------------------------------------------------------------------
def eye_classifier_forward(x, params):
    (w_conv, b_conv, w1, b1, w2, b2) = params
    N, Cin, H, W = x.shape
    Cout, _, KH, KW = w_conv.shape
    Hp, Wp = H // 2, W // 2
    H1 = w1.shape[1]
    Out = w2.shape[1]

    # ---- im2col with pool-friendly row order --------------------------------
    # row = g*(N*Hp*Wp) + n*(Hp*Wp) + hh*Wp + ww,  g = dh*2 + dw,
    # conv position (h, w) = (2*hh + dh, 2*ww + dw); col = (kh*KW + kw)*Cin + cin.
    x_nhwc = jnp.transpose(x, (0, 2, 3, 1))                      # (N,H,W,Cin)
    x_pad = jnp.pad(x_nhwc, ((0, 0), (1, 1), (1, 1), (0, 0)))    # (N,H+2,W+2,Cin)
    taps = []
    for kh in range(KH):
        for kw in range(KW):
            s = x_pad[:, kh:kh + H, kw:kw + W, :]                # (N,H,W,Cin)
            s = s.reshape(N, Hp, 2, Wp, 2, Cin)                  # (n,hh,dh,ww,dw,cin)
            s = jnp.transpose(s, (2, 4, 0, 1, 3, 5))             # (dh,dw,n,hh,ww,cin)
            taps.append(s.reshape(4 * N * Hp * Wp, Cin))         # (512, Cin)
    patches = jnp.concatenate(taps, axis=1)                      # (512, 9*Cin)

    # conv weight (Cout,Cin,KH,KW) -> (KH*KW*Cin, Cout), matching patch columns.
    wc = jnp.transpose(w_conv, (2, 3, 1, 0)).reshape(KH * KW * Cin, Cout)

    # Fold PyTorch's NCHW flatten (outp.view(-1, Cout*Hp*Wp)) into Linear1:
    # w1r[c, n*Hp*Wp + p, j] = w1[c*Hp*Wp + p, j]   (batch-replicated rows).
    w1r = jnp.broadcast_to(w1.reshape(Cout, Hp * Wp, H1)[:, None],
                           (Cout, N, Hp * Wp, H1)).reshape(Cout, N * Hp * Wp, H1)

    bc = b_conv.reshape(1, Cout)
    b1r = b1.reshape(1, H1)
    b2r = b2.reshape(1, Out)

    flops = (2 * (4 * N * Hp * Wp) * (KH * KW * Cin) * Cout
             + 2 * N * (Cout * Hp * Wp) * H1
             + 2 * N * H1 * Out)
    bytes_accessed = 4 * (patches.size + wc.size + bc.size + w1r.size
                          + b1r.size + w2.size + b2r.size + N * Out)

    vmem_spec = pl.BlockSpec(memory_space=pltpu.MemorySpace.VMEM)
    return pl.pallas_call(
        eye_fused_kernel,
        out_shape=jax.ShapeDtypeStruct((N, Out), jnp.float32),
        in_specs=[vmem_spec] * 7,
        out_specs=vmem_spec,
        cost_estimate=pl.CostEstimate(flops=flops,
                                      transcendentals=N * Out,
                                      bytes_accessed=bytes_accessed),
    )(patches, wc, bc, w1r, b1r, w2, b2r)


# ----------------------------------------------------------------------------
# Pure-JAX reference (mirrors the PyTorch forward semantics)
# ----------------------------------------------------------------------------
def reference_forward(x, params):
    (w_conv, b_conv, w1, b1, w2, b2) = params
    y = lax.conv_general_dilated(
        x, w_conv, window_strides=(1, 1), padding=((1, 1), (1, 1)),
        dimension_numbers=("NCHW", "OIHW", "NCHW"),
        precision=lax.Precision.HIGHEST)
    y = jnp.maximum(y + b_conv.reshape(1, -1, 1, 1), 0.0)
    y = lax.reduce_window(y, -jnp.inf, lax.max,
                          (1, 1, 2, 2), (1, 1, 2, 2), "VALID")
    y = y.reshape(y.shape[0], -1)
    y = jnp.maximum(jnp.dot(y, w1, precision=lax.Precision.HIGHEST) + b1, 0.0)
    y = jnp.dot(y, w2, precision=lax.Precision.HIGHEST) + b2
    return jax.nn.sigmoid(y)


# ----------------------------------------------------------------------------
if __name__ == "__main__":
    key = jax.random.PRNGKey(0)
    kx, kc, kcb, k1, k1b, k2, k2b = jax.random.split(key, 7)

    N, Cin, H, W = 2, 4, 16, 16
    Cout, H1, Out = 8, 32, 2
    F = Cout * (H // 2) * (W // 2)  # 512

    x = jax.random.normal(kx, (N, Cin, H, W), dtype=jnp.float32)

    # Deterministic synthetic parameters (shapes follow the chosen nn.Modules).
    w_conv = 0.10 * jax.random.normal(kc, (Cout, Cin, 3, 3), dtype=jnp.float32)
    b_conv = 0.05 * jax.random.normal(kcb, (Cout,), dtype=jnp.float32)
    w1 = 0.02 * jax.random.normal(k1, (F, H1), dtype=jnp.float32)    # Linear1.weight.T
    b1 = 0.05 * jax.random.normal(k1b, (H1,), dtype=jnp.float32)
    w2 = 0.10 * jax.random.normal(k2, (H1, Out), dtype=jnp.float32)  # Linear2.weight.T
    b2 = 0.05 * jax.random.normal(k2b, (Out,), dtype=jnp.float32)
    params = (w_conv, b_conv, w1, b1, w2, b2)

    fwd = jax.jit(eye_classifier_forward)
    out = jax.block_until_ready(fwd(x, params))

    ref = reference_forward(x, params)
    assert out.shape == (N, Out) and out.dtype == jnp.float32
    assert jnp.allclose(out, ref, atol=1e-2, rtol=1e-2), (out, ref)

    print("KERNEL_OK")
</pallas_src>

<mosaic_0001>
module attributes {stable_mosaic.version = 11 : i64} {
  func.func @eye_fused_kernel(%arg0: memref<512x36xf32, #tpu.memory_space<vmem>>, %arg1: memref<36x8xf32, #tpu.memory_space<vmem>>, %arg2: memref<1x8xf32, #tpu.memory_space<vmem>>, %arg3: memref<8x128x32xf32, #tpu.memory_space<vmem>>, %arg4: memref<1x32xf32, #tpu.memory_space<vmem>>, %arg5: memref<32x2xf32, #tpu.memory_space<vmem>>, %arg6: memref<1x2xf32, #tpu.memory_space<vmem>>, %arg7: memref<2x2xf32, #tpu.memory_space<vmem>>) attributes {dimension_semantics = [], scalar_prefetch = 0 : i64, scratch_operands = 0 : i64, tpu.core_type = #tpu.core_type<tc>} {
    %c0 = arith.constant 0 : index
    %c0_0 = arith.constant 0 : index
    %0 = vector.load %arg0[%c0, %c0_0] : memref<512x36xf32, #tpu.memory_space<vmem>>, vector<512x36xf32>
    %c0_1 = arith.constant 0 : index
    %c0_2 = arith.constant 0 : index
    %1 = vector.load %arg1[%c0_1, %c0_2] : memref<36x8xf32, #tpu.memory_space<vmem>>, vector<36x8xf32>
    %cst = arith.constant dense<0.000000e+00> : vector<512x8xf32>
    %2 = tpu.matmul %0, %1, %cst {dimension_numbers = #tpu.dot_dimension_numbers<[1], [0], [0], [1], [0, 0, 1, 1], [], []>} : vector<512x36xf32>, vector<36x8xf32>, vector<512x8xf32> -> vector<512x8xf32>
    %c0_3 = arith.constant 0 : index
    %c0_4 = arith.constant 0 : index
    %3 = vector.load %arg2[%c0_3, %c0_4] : memref<1x8xf32, #tpu.memory_space<vmem>>, vector<1x8xf32>
    %4 = vector.broadcast %3 : vector<1x8xf32> to vector<512x8xf32>
    %5 = arith.addf %2, %4 : vector<512x8xf32>
    %cst_5 = arith.constant 0.000000e+00 : f32
    %6 = vector.broadcast %cst_5 : f32 to vector<512x8xf32>
    %7 = arith.maximumf %5, %6 : vector<512x8xf32>
    %8 = vector.extract_strided_slice %7 {offsets = [0, 0], sizes = [128, 8], strides = [1, 1]} : vector<512x8xf32> to vector<128x8xf32>
    %9 = vector.extract_strided_slice %7 {offsets = [128, 0], sizes = [128, 8], strides = [1, 1]} : vector<512x8xf32> to vector<128x8xf32>
    %10 = arith.maximumf %8, %9 : vector<128x8xf32>
    %11 = vector.extract_strided_slice %7 {offsets = [256, 0], sizes = [128, 8], strides = [1, 1]} : vector<512x8xf32> to vector<128x8xf32>
    %12 = vector.extract_strided_slice %7 {offsets = [384, 0], sizes = [128, 8], strides = [1, 1]} : vector<512x8xf32> to vector<128x8xf32>
    %13 = arith.maximumf %11, %12 : vector<128x8xf32>
    %14 = arith.maximumf %10, %13 : vector<128x8xf32>
    %15 = vector.extract_strided_slice %14 {offsets = [0, 0], sizes = [128, 1], strides = [1, 1]} : vector<128x8xf32> to vector<128x1xf32>
    %c0_6 = arith.constant 0 : index
    %c0_7 = arith.constant 0 : index
    %c0_8 = arith.constant 0 : index
    %16 = vector.load %arg3[%c0_6, %c0_7, %c0_8] : memref<8x128x32xf32, #tpu.memory_space<vmem>>, vector<1x128x32xf32>
    %17 = vector.shape_cast %16 : vector<1x128x32xf32> to vector<128x32xf32>
    %18 = vector.broadcast %15 : vector<128x1xf32> to vector<128x32xf32>
    %19 = arith.mulf %18, %17 : vector<128x32xf32>
    %20 = vector.extract_strided_slice %14 {offsets = [0, 1], sizes = [128, 1], strides = [1, 1]} : vector<128x8xf32> to vector<128x1xf32>
    %c1 = arith.constant 1 : index
    %c0_9 = arith.constant 0 : index
    %c0_10 = arith.constant 0 : index
    %21 = vector.load %arg3[%c1, %c0_9, %c0_10] : memref<8x128x32xf32, #tpu.memory_space<vmem>>, vector<1x128x32xf32>
    %22 = vector.shape_cast %21 : vector<1x128x32xf32> to vector<128x32xf32>
    %23 = vector.broadcast %20 : vector<128x1xf32> to vector<128x32xf32>
    %24 = arith.mulf %23, %22 : vector<128x32xf32>
    %25 = arith.addf %19, %24 : vector<128x32xf32>
    %26 = vector.extract_strided_slice %14 {offsets = [0, 2], sizes = [128, 1], strides = [1, 1]} : vector<128x8xf32> to vector<128x1xf32>
    %c2 = arith.constant 2 : index
    %c0_11 = arith.constant 0 : index
    %c0_12 = arith.constant 0 : index
    %27 = vector.load %arg3[%c2, %c0_11, %c0_12] : memref<8x128x32xf32, #tpu.memory_space<vmem>>, vector<1x128x32xf32>
    %28 = vector.shape_cast %27 : vector<1x128x32xf32> to vector<128x32xf32>
    %29 = vector.broadcast %26 : vector<128x1xf32> to vector<128x32xf32>
    %30 = arith.mulf %29, %28 : vector<128x32xf32>
    %31 = arith.addf %25, %30 : vector<128x32xf32>
    %32 = vector.extract_strided_slice %14 {offsets = [0, 3], sizes = [128, 1], strides = [1, 1]} : vector<128x8xf32> to vector<128x1xf32>
    %c3 = arith.constant 3 : index
    %c0_13 = arith.constant 0 : index
    %c0_14 = arith.constant 0 : index
    %33 = vector.load %arg3[%c3, %c0_13, %c0_14] : memref<8x128x32xf32, #tpu.memory_space<vmem>>, vector<1x128x32xf32>
    %34 = vector.shape_cast %33 : vector<1x128x32xf32> to vector<128x32xf32>
    %35 = vector.broadcast %32 : vector<128x1xf32> to vector<128x32xf32>
    %36 = arith.mulf %35, %34 : vector<128x32xf32>
    %37 = arith.addf %31, %36 : vector<128x32xf32>
    %38 = vector.extract_strided_slice %14 {offsets = [0, 4], sizes = [128, 1], strides = [1, 1]} : vector<128x8xf32> to vector<128x1xf32>
    %c4 = arith.constant 4 : index
    %c0_15 = arith.constant 0 : index
    %c0_16 = arith.constant 0 : index
    %39 = vector.load %arg3[%c4, %c0_15, %c0_16] : memref<8x128x32xf32, #tpu.memory_space<vmem>>, vector<1x128x32xf32>
    %40 = vector.shape_cast %39 : vector<1x128x32xf32> to vector<128x32xf32>
    %41 = vector.broadcast %38 : vector<128x1xf32> to vector<128x32xf32>
    %42 = arith.mulf %41, %40 : vector<128x32xf32>
    %43 = arith.addf %37, %42 : vector<128x32xf32>
    %44 = vector.extract_strided_slice %14 {offsets = [0, 5], sizes = [128, 1], strides = [1, 1]} : vector<128x8xf32> to vector<128x1xf32>
    %c5 = arith.constant 5 : index
    %c0_17 = arith.constant 0 : index
    %c0_18 = arith.constant 0 : index
    %45 = vector.load %arg3[%c5, %c0_17, %c0_18] : memref<8x128x32xf32, #tpu.memory_space<vmem>>, vector<1x128x32xf32>
    %46 = vector.shape_cast %45 : vector<1x128x32xf32> to vector<128x32xf32>
    %47 = vector.broadcast %44 : vector<128x1xf32> to vector<128x32xf32>
    %48 = arith.mulf %47, %46 : vector<128x32xf32>
    %49 = arith.addf %43, %48 : vector<128x32xf32>
    %50 = vector.extract_strided_slice %14 {offsets = [0, 6], sizes = [128, 1], strides = [1, 1]} : vector<128x8xf32> to vector<128x1xf32>
    %c6 = arith.constant 6 : index
    %c0_19 = arith.constant 0 : index
    %c0_20 = arith.constant 0 : index
    %51 = vector.load %arg3[%c6, %c0_19, %c0_20] : memref<8x128x32xf32, #tpu.memory_space<vmem>>, vector<1x128x32xf32>
    %52 = vector.shape_cast %51 : vector<1x128x32xf32> to vector<128x32xf32>
    %53 = vector.broadcast %50 : vector<128x1xf32> to vector<128x32xf32>
    %54 = arith.mulf %53, %52 : vector<128x32xf32>
    %55 = arith.addf %49, %54 : vector<128x32xf32>
    %56 = vector.extract_strided_slice %14 {offsets = [0, 7], sizes = [128, 1], strides = [1, 1]} : vector<128x8xf32> to vector<128x1xf32>
    %c7 = arith.constant 7 : index
    %c0_21 = arith.constant 0 : index
    %c0_22 = arith.constant 0 : index
    %57 = vector.load %arg3[%c7, %c0_21, %c0_22] : memref<8x128x32xf32, #tpu.memory_space<vmem>>, vector<1x128x32xf32>
    %58 = vector.shape_cast %57 : vector<1x128x32xf32> to vector<128x32xf32>
    %59 = vector.broadcast %56 : vector<128x1xf32> to vector<128x32xf32>
    %60 = arith.mulf %59, %58 : vector<128x32xf32>
    %61 = arith.addf %55, %60 : vector<128x32xf32>
    %62 = vector.shape_cast %61 : vector<128x32xf32> to vector<2x64x32xf32>
    %cst_23 = arith.constant dense<0.000000e+00> : vector<2x32xf32>
    %63 = vector.multi_reduction <add>, %62, %cst_23 [1] : vector<2x64x32xf32> to vector<2x32xf32>
    %c0_24 = arith.constant 0 : index
    %c0_25 = arith.constant 0 : index
    %64 = vector.load %arg4[%c0_24, %c0_25] : memref<1x32xf32, #tpu.memory_space<vmem>>, vector<1x32xf32>
    %65 = vector.broadcast %64 : vector<1x32xf32> to vector<2x32xf32>
    %66 = arith.addf %63, %65 : vector<2x32xf32>
    %cst_26 = arith.constant 0.000000e+00 : f32
    %67 = vector.broadcast %cst_26 : f32 to vector<2x32xf32>
    %68 = arith.maximumf %66, %67 : vector<2x32xf32>
    %c0_27 = arith.constant 0 : index
    %c0_28 = arith.constant 0 : index
    %69 = vector.load %arg5[%c0_27, %c0_28] : memref<32x2xf32, #tpu.memory_space<vmem>>, vector<32x2xf32>
    %cst_29 = arith.constant dense<0.000000e+00> : vector<2x2xf32>
    %70 = tpu.matmul %68, %69, %cst_29 {dimension_numbers = #tpu.dot_dimension_numbers<[1], [0], [0], [1], [0, 0, 1, 1], [], []>} : vector<2x32xf32>, vector<32x2xf32>, vector<2x2xf32> -> vector<2x2xf32>
    %c0_30 = arith.constant 0 : index
    %c0_31 = arith.constant 0 : index
    %71 = vector.load %arg6[%c0_30, %c0_31] : memref<1x2xf32, #tpu.memory_space<vmem>>, vector<1x2xf32>
    %72 = vector.broadcast %71 : vector<1x2xf32> to vector<2x2xf32>
    %73 = arith.addf %70, %72 : vector<2x2xf32>
    %74 = arith.negf %73 : vector<2x2xf32>
    %75 = math.exp %74 : vector<2x2xf32>
    %cst_32 = arith.constant 1.000000e+00 : f32
    %76 = vector.broadcast %cst_32 : f32 to vector<2x2xf32>
    %77 = arith.addf %76, %75 : vector<2x2xf32>
    %78 = arith.divf %76, %77 : vector<2x2xf32>
    %c0_33 = arith.constant 0 : index
    %c0_34 = arith.constant 0 : index
    %79 = vector.load %arg7[%c0_33, %c0_34] : memref<2x2xf32, #tpu.memory_space<vmem>>, vector<2x2xf32>
    tpu.vector_store %arg7[%c0_33, %c0_34], %78 {strides = array<i32>} : memref<2x2xf32, #tpu.memory_space<vmem>>, vector<2x2xf32>,
    return
  }
}

</mosaic_0001>

<bundles_post_ra>
// kernel: eye_classifier_forward.1
= control target key start
LH: loop header
LB: loop body
LE: loop exit
PB: predicated region body
PF: predicated region fallthrough
CT: control target
= control target key end

     0   :  { %vm103_vm0 = vcmask 293888   ;;  %vm296_vm1 = vcmask 1043456   ;;  %s3902_s0 = inlined_call_operand.vmem [shape: f32[512,36], index: 0, kind: input, shape index: {}]   ;;  %s3903_s1 = inlined_call_operand.vmem [shape: f32[36,8], index: 1, kind: input, shape index: {}]   ;;  %s3904_s2 = inlined_call_operand.vmem [shape: f32[1,8], index: 2, kind: input, shape index: {}]   ;;  %s3905_s3 = inlined_call_operand.vmem [shape: f32[8,128,32], index: 3, kind: input, shape index: {}]   ;;  %s3906_s4 = inlined_call_operand.vmem [shape: f32[1,32], index: 4, kind: input, shape index: {}]   ;;  %s3907_s5 = inlined_call_operand.vmem [shape: f32[32,2], index: 5, kind: input, shape index: {}]   ;;  %s3908_s6 = inlined_call_operand.vmem [shape: f32[1,2], index: 6, kind: input, shape index: {}]   ;;  %s3909_s7 = inlined_call_operand.hbm [shape: f32[2,2], index: 7, kind: output, shape index: {}]  }
   0x1   :  { %v91_v0 = vld [vmem:[%s3903_s1] sm:$0xff]  ;;  %v92_v1 = vld [vmem:[%s3903_s1 + $0x8] sm:$0xff]  ;;  %v93_v2 = vld [vmem:[%s3903_s1 + $0x10] sm:$0xff] }
   0x2   :  { %v2237_v3 = vpack.c.bf16 %v92_v1, %v91_v0  ;;  %v94_v4 = vld [vmem:[%s3903_s1 + $0x18] sm:$0xff]  ;;  %v27_v5 = vld [vmem:[%s3902_s0] sm:$0xff]  ;;  %v61_v7 = vld [vmem:[%s3902_s0 + $0x110] sm:$0xff] }
   0x3   :  { %v2241_v6 = vpack.c.bf16 %v94_v4, %v93_v2  ;;  %2130 = vmatprep.mubr.msk.f32.mxu0 %vm103_vm0, %v27_v5  ;;  %v95_v8 = vld [vmem:[%s3903_s1 + $0x20] sm:$0xf]  ;;  %2181 = vmatprep.mubr.msk.f32.mxu1 %vm103_vm0, %v61_v7  ;;  %v28_v9 = vld [vmem:[%s3902_s0 + $0x8] sm:$0xff]  ;;  %v62_v10 = vld [vmem:[%s3902_s0 + $0x118] sm:$0xff] }
   0x4   :  { %2238 = vmatprep.subr.bf16.mxu0 %v2237_v3  ;;  %2251 = vmatprep.subr.bf16.mxu1 %v2237_v3  ;;  %v29_v11 = vld [vmem:[%s3902_s0 + $0x10] sm:$0xff]  ;;  %v63_v12 = vld [vmem:[%s3902_s0 + $0x120] sm:$0xff]  ;;  %v30_v13 = vld [vmem:[%s3902_s0 + $0x18] sm:$0xff] }
   0x5   :  { %2240 = vmatpush3.bf16.msra.mxu0 %v2237_v3  ;;  %2254 = vmatpush3.bf16.msra.mxu1 %v2237_v3  ;;  %v64_v14 = vld [vmem:[%s3902_s0 + $0x128] sm:$0xff]  ;;  %v31_v15 = vld [vmem:[%s3902_s0 + $0x20] sm:$0xff]  ;;  %v65_v16 = vld [vmem:[%s3902_s0 + $0x130] sm:$0xff] }
   0x6   :  { %2242 = vmatprep.subr.bf16.mxu0 %v2241_v6  ;;  %2252 = vmatprep.subr.bf16.mxu1 %v2241_v6  ;;  %v32_v17 = vld [vmem:[%s3902_s0 + $0x28] sm:$0xff]  ;;  %v66_v18 = vld [vmem:[%s3902_s0 + $0x138] sm:$0xff]  ;;  %v33_v19 = vld [vmem:[%s3902_s0 + $0x30] sm:$0xff] }
   0x7   :  { %v67_v20 = vld [vmem:[%s3902_s0 + $0x140] sm:$0xff]  ;;  %v34_v21 = vld [vmem:[%s3902_s0 + $0x38] sm:$0xff]  ;;  %v68_v22 = vld [vmem:[%s3902_s0 + $0x148] sm:$0xff] }
   0x8   :  { %v35_v23 = vld [vmem:[%s3902_s0 + $0x40] sm:$0xff]  ;;  %v69_v24 = vld [vmem:[%s3902_s0 + $0x150] sm:$0xff] }
   0x9   :  { %2244 = vmatpush3.bf16.msra.mxu0 %v2241_v6  ;;  %2255 = vmatpush3.bf16.msra.mxu1 %v2241_v6 }
   0xa   :  { %2128 = vmatprep.subr.msk.mxu0 %vm296_vm1, %v95_v8  ;;  %2253 = vmatprep.subr.msk.mxu1 %vm296_vm1, %v95_v8 }
   0xd   :  { %2129 = vmatpush3.msk.msra.mxu0 %vm296_vm1, %v95_v8  ;;  %2256 = vmatpush3.msk.msra.mxu1 %vm296_vm1, %v95_v8 }
   0xe   :  { %2131 = vmatmul.mubr.msk.f32.vlgmr.msra.gmra.mrb[0].mxu0 %vm103_vm0, %v28_v9  ;;  %2182 = vmatmul.mubr.msk.f32.vlgmr.msra.gmra.mrb[0].mxu1 %vm103_vm0, %v62_v10 }
   0xf   :  { %2133 = vmatprep.mubr.msk.f32.mxu0 %vm103_vm0, %v29_v11  ;;  %2184 = vmatprep.mubr.msk.f32.mxu1 %vm103_vm0, %v63_v12 }
  0x12   :  { %2134 = vmatmul.mubr.msk.f32.gmra.mrb[2].mxu0 %vm103_vm0, %v30_v13  ;;  %2185 = vmatmul.mubr.msk.f32.gmra.mrb[2].mxu1 %vm103_vm0, %v64_v14 }
  0x13   :  { %2136 = vmatprep.mubr.msk.f32.mxu0 %vm103_vm0, %v31_v15  ;;  %2187 = vmatprep.mubr.msk.f32.mxu1 %vm103_vm0, %v65_v16 }
  0x16   :  { %2137 = vmatmul.mubr.msk.f32.gmra.mrb[4].mxu0 %vm103_vm0, %v32_v17  ;;  %2188 = vmatmul.mubr.msk.f32.gmra.mrb[4].mxu1 %vm103_vm0, %v66_v18 }
  0x17   :  { %2139 = vmatprep.mubr.msk.f32.mxu0 %vm103_vm0, %v33_v19  ;;  %2190 = vmatprep.mubr.msk.f32.mxu1 %vm103_vm0, %v67_v20 }
  0x18   :  { %12 = vsyncpa [#allocation3], 0  ;;  %v36_v25 = vld [vmem:[%s3902_s0 + $0x48] sm:$0xff]  ;;  %v70_v26 = vld [vmem:[%s3902_s0 + $0x158] sm:$0xff]  ;;  %v3912_v7 = vmov 1   ;;  %v3910_v8 = vmov 0  }
  0x19   :  { %v37_v27 = vld [vmem:[%s3902_s0 + $0x50] sm:$0xff]  ;;  %v71_v28 = vld [vmem:[%s3902_s0 + $0x160] sm:$0xff]  ;;  %v38_v29 = vld [vmem:[%s3902_s0 + $0x58] sm:$0xff]  ;;  %2270 = vset.pattern.permute.xlu0 %v3912_v7  ;;  %2269 = vset.pattern.permute.xlu1 %v3910_v8  ;;  %vm1700_vm2 = vcmask 261120   ;;  %vm2427_vm3 = vmmov 0   ;;  %vm1768_vm4 = vcmask 1041409  }
  0x1a   :  { %2140 = vmatmul.mubr.msk.f32.gmra.mrb[6].mxu0 %vm103_vm0, %v34_v21  ;;  %2191 = vmatmul.mubr.msk.f32.gmra.mrb[6].mxu1 %vm103_vm0, %v68_v22  ;;  %v72_v30 = vld [vmem:[%s3902_s0 + $0x168] sm:$0xff]  ;;  %v39_v31 = vld [vmem:[%s3902_s0 + $0x60] sm:$0xff]  ;;  %v73_v32 = vld [vmem:[%s3902_s0 + $0x170] sm:$0xff]  ;;  %vm1848_vm5 = vcmask 9216  }
  0x1b   :  { %2142 = vmatprep.mubr.msk.f32.mxu0 %vm103_vm0, %v35_v23  ;;  %2193 = vmatprep.mubr.msk.f32.mxu1 %vm103_vm0, %v69_v24  ;;  %v40_v33 = vld [vmem:[%s3902_s0 + $0x68] sm:$0xff]  ;;  %v74_v34 = vld [vmem:[%s3902_s0 + $0x178] sm:$0xff]  ;;  %v41_v35 = vld [vmem:[%s3902_s0 + $0x70] sm:$0xff] }
  0x1c   :  { %v75_v36 = vld [vmem:[%s3902_s0 + $0x180] sm:$0xff]  ;;  %v42_v37 = vld [vmem:[%s3902_s0 + $0x78] sm:$0xff]  ;;  %v76_v38 = vld [vmem:[%s3902_s0 + $0x188] sm:$0xff] }
  0x1d   :  { %v43_v39 = vld [vmem:[%s3902_s0 + $0x80] sm:$0xff]  ;;  %v77_v40 = vld [vmem:[%s3902_s0 + $0x190] sm:$0xff]  ;;  %v44_v41 = vld [vmem:[%s3902_s0 + $0x88] sm:$0xff] }
  0x1e   :  { %2143 = vmatmul.mubr.msk.f32.gmra.mrb[8].mxu0 %vm103_vm0, %v36_v25  ;;  %2194 = vmatmul.mubr.msk.f32.gmra.mrb[8].mxu1 %vm103_vm0, %v70_v26  ;;  %v78_v42 = vld [vmem:[%s3902_s0 + $0x198] sm:$0xff]  ;;  %v45_v43 = vld [vmem:[%s3902_s0 + $0x90] sm:$0xff]  ;;  %v79_v44 = vld [vmem:[%s3902_s0 + $0x1a0] sm:$0xff] }
  0x1f   :  { %2145 = vmatprep.mubr.msk.f32.mxu0 %vm103_vm0, %v37_v27  ;;  %2196 = vmatprep.mubr.msk.f32.mxu1 %vm103_vm0, %v71_v28  ;;  %v46_v45 = vld [vmem:[%s3902_s0 + $0x98] sm:$0xff]  ;;  %v80_v46 = vld [vmem:[%s3902_s0 + $0x1a8] sm:$0xff]  ;;  %v47_v47 = vld [vmem:[%s3902_s0 + $0xa0] sm:$0xff] }
  0x20   :  { %v81_v48 = vld [vmem:[%s3902_s0 + $0x1b0] sm:$0xff]  ;;  %v48_v49 = vld [vmem:[%s3902_s0 + $0xa8] sm:$0xff]  ;;  %v82_v50 = vld [vmem:[%s3902_s0 + $0x1b8] sm:$0xff] }
  0x21   :  { %v49_v51 = vld [vmem:[%s3902_s0 + $0xb0] sm:$0xff]  ;;  %v83_v52 = vld [vmem:[%s3902_s0 + $0x1c0] sm:$0xff]  ;;  %v50_v53 = vld [vmem:[%s3902_s0 + $0xb8] sm:$0xff] }
  0x22   :  { %2146 = vmatmul.mubr.msk.f32.gmra.mrb[10].mxu0 %vm103_vm0, %v38_v29  ;;  %2197 = vmatmul.mubr.msk.f32.gmra.mrb[10].mxu1 %vm103_vm0, %v72_v30  ;;  %v84_v54 = vld [vmem:[%s3902_s0 + $0x1c8] sm:$0xff]  ;;  %v51_v55 = vld [vmem:[%s3902_s0 + $0xc0] sm:$0xff]  ;;  %v85_v56 = vld [vmem:[%s3902_s0 + $0x1d0] sm:$0xff] }
  0x23   :  { %2148 = vmatprep.mubr.msk.f32.mxu0 %vm103_vm0, %v39_v31  ;;  %2199 = vmatprep.mubr.msk.f32.mxu1 %vm103_vm0, %v73_v32  ;;  %v52_v57 = vld [vmem:[%s3902_s0 + $0xc8] sm:$0xff]  ;;  %v86_v58 = vld [vmem:[%s3902_s0 + $0x1d8] sm:$0xff]  ;;  %v53_v59 = vld [vmem:[%s3902_s0 + $0xd0] sm:$0xff] }
  0x24   :  { %v87_v60 = vld [vmem:[%s3902_s0 + $0x1e0] sm:$0xff]  ;;  %v54_v61 = vld [vmem:[%s3902_s0 + $0xd8] sm:$0xff]  ;;  %v88_v62 = vld [vmem:[%s3902_s0 + $0x1e8] sm:$0xff] }
  0x25   :  { %v55_v63 = vld [vmem:[%s3902_s0 + $0xe0] sm:$0xff]  ;;  %v89_v0 = vld [vmem:[%s3902_s0 + $0x1f0] sm:$0xff]  ;;  %v56_v1 = vld [vmem:[%s3902_s0 + $0xe8] sm:$0xff] }
  0x26   :  { %2149 = vmatmul.mubr.msk.f32.gmra.mrb[12].mxu0 %vm103_vm0, %v40_v33  ;;  %2200 = vmatmul.mubr.msk.f32.gmra.mrb[12].mxu1 %vm103_vm0, %v74_v34  ;;  %v90_v2 = vld [vmem:[%s3902_s0 + $0x1f8] sm:$0xff]  ;;  %v57_v3 = vld [vmem:[%s3902_s0 + $0xf0] sm:$0xff]  ;;  %v59_v5 = vld [vmem:[%s3902_s0 + $0x100] sm:$0xff] }
  0x27   :  { %2151 = vmatprep.mubr.msk.f32.mxu0 %vm103_vm0, %v41_v35  ;;  %2202 = vmatprep.mubr.msk.f32.mxu1 %vm103_vm0, %v75_v36  ;;  %v58_v4 = vld [vmem:[%s3902_s0 + $0xf8] sm:$0xff]  ;;  %v60_v6 = vld [vmem:[%s3902_s0 + $0x108] sm:$0xff]  ;;  %v2746_v29 = vld [vmem:[%s3904_s2] ss:$0 sm:$0xff] }
  0x2a   :  { %2152 = vmatmul.mubr.msk.f32.gmra.mrb[14].mxu0 %vm103_vm0, %v42_v37  ;;  %2203 = vmatmul.mubr.msk.f32.gmra.mrb[14].mxu1 %vm103_vm0, %v76_v38 }
  0x2b   :  { %2154 = vmatprep.mubr.msk.f32.mxu0 %vm103_vm0, %v43_v39  ;;  %2205 = vmatprep.mubr.msk.f32.mxu1 %vm103_vm0, %v77_v40 }
  0x2e   :  { %2155 = vmatmul.mubr.msk.f32.gmra.mrb[16].mxu0 %vm103_vm0, %v44_v41  ;;  %2206 = vmatmul.mubr.msk.f32.gmra.mrb[16].mxu1 %vm103_vm0, %v78_v42 }
  0x2f   :  { %2157 = vmatprep.mubr.msk.f32.mxu0 %vm103_vm0, %v45_v43  ;;  %2208 = vmatprep.mubr.msk.f32.mxu1 %vm103_vm0, %v79_v44 }
  0x32   :  { %2158 = vmatmul.mubr.msk.f32.gmra.mrb[18].mxu0 %vm103_vm0, %v46_v45  ;;  %2209 = vmatmul.mubr.msk.f32.gmra.mrb[18].mxu1 %vm103_vm0, %v80_v46 }
  0x33   :  { %2160 = vmatprep.mubr.msk.f32.mxu0 %vm103_vm0, %v47_v47  ;;  %2211 = vmatprep.mubr.msk.f32.mxu1 %vm103_vm0, %v81_v48 }
  0x36   :  { %2161 = vmatmul.mubr.msk.f32.gmra.mrb[20].mxu0 %vm103_vm0, %v48_v49  ;;  %2212 = vmatmul.mubr.msk.f32.gmra.mrb[20].mxu1 %vm103_vm0, %v82_v50 }
  0x37   :  { %2163 = vmatprep.mubr.msk.f32.mxu0 %vm103_vm0, %v49_v51  ;;  %2214 = vmatprep.mubr.msk.f32.mxu1 %vm103_vm0, %v83_v52 }
  0x3a   :  { %2164 = vmatmul.mubr.msk.f32.gmra.mrb[22].mxu0 %vm103_vm0, %v50_v53  ;;  %2215 = vmatmul.mubr.msk.f32.gmra.mrb[22].mxu1 %vm103_vm0, %v84_v54 }
  0x3b   :  { %2166 = vmatprep.mubr.msk.f32.mxu0 %vm103_vm0, %v51_v55  ;;  %2217 = vmatprep.mubr.msk.f32.mxu1 %vm103_vm0, %v85_v56 }
  0x3e   :  { %2167 = vmatmul.mubr.msk.f32.gmra.mrb[24].mxu0 %vm103_vm0, %v52_v57  ;;  %2218 = vmatmul.mubr.msk.f32.gmra.mrb[24].mxu1 %vm103_vm0, %v86_v58 }
  0x3f   :  { %2169 = vmatprep.mubr.msk.f32.mxu0 %vm103_vm0, %v53_v59  ;;  %2220 = vmatprep.mubr.msk.f32.mxu1 %vm103_vm0, %v87_v60 }
  0x42   :  { %2170 = vmatmul.mubr.msk.f32.gmra.mrb[26].mxu0 %vm103_vm0, %v54_v61  ;;  %2221 = vmatmul.mubr.msk.f32.gmra.mrb[26].mxu1 %vm103_vm0, %v88_v62 }
  0x43   :  { %2172 = vmatprep.mubr.msk.f32.mxu0 %vm103_vm0, %v55_v63  ;;  %2223 = vmatprep.mubr.msk.f32.mxu1 %vm103_vm0, %v89_v0 }
  0x46   :  { %2173 = vmatmul.mubr.msk.f32.gmra.mrb[28].mxu0 %vm103_vm0, %v56_v1  ;;  %2224 = vmatmul.mubr.msk.f32.gmra.mrb[28].mxu1 %vm103_vm0, %v90_v2 }
  0x47   :  { %2175 = vmatprep.mubr.msk.f32.mxu0 %vm103_vm0, %v57_v3 }
  0x4a   :  { %2176 = vmatmul.mubr.msk.f32.gmra.mrb[30].mxu0 %vm103_vm0, %v58_v4 }
  0x4b   :  { %2178 = vmatprep.mubr.msk.f32.mxu0 %vm103_vm0, %v59_v5 }
  0x4e   :  { %2179 = vmatmul.mubr.msk.f32.gmra.mrb[32].mxu0 %vm103_vm0, %v60_v6 }
  0xe1   :  { %v2132_v9 = vpop.f32.mrb[0].mxu0  ;;  %v2183_v10 = vpop.f32.mrb[0].mxu1 }
  0xe2   :  { %v366_v11 = vpop.f32.mrb[1].mxu0  ;;  %v536_v12 = vpop.f32.mrb[1].mxu1  ;;  %v2749_v32 = vadd.f32 %v2132_v9, %v2746_v29  ;;  %v2752_v33 = vadd.f32 %v2183_v10, %v2746_v29 }
  0xe3   :  { %v2755_v36 = vadd.f32 %v2746_v29, %v366_v11  ;;  %v2758_v37 = vadd.f32 %v2746_v29, %v536_v12 }
  0xe4   :  { %v686_v40 = vmax.f32 %v2749_v32, 0.0  ;;  %v720_v41 = vmax.f32 %v2752_v33, 0.0 }
  0xe5   :  { %v2135_v13 = vpop.f32.mrb[2].mxu0  ;;  %v2186_v14 = vpop.f32.mrb[2].mxu1  ;;  %v685_v46 = vmax.f32 %v2755_v36, 0.0  ;;  %v719_v47 = vmax.f32 %v2758_v37, 0.0 }
  0xe6   :  { %v376_v15 = vpop.f32.mrb[3].mxu0  ;;  %v546_v16 = vpop.f32.mrb[3].mxu1  ;;  %v2767_v42 = vadd.f32 %v2135_v13, %v2746_v29  ;;  %v2770_v43 = vadd.f32 %v2186_v14, %v2746_v29 }
  0xe7   :  { %v2779_v48 = vadd.f32 %v2746_v29, %v376_v15  ;;  %v2782_v49 = vadd.f32 %v2746_v29, %v546_v16 }
  0xe8   :  { %v688_v60 = vmax.f32 %v2767_v42, 0.0  ;;  %v722_v61 = vmax.f32 %v2770_v43, 0.0 }
  0xe9   :  { %v2138_v17 = vpop.f32.mrb[4].mxu0  ;;  %v2189_v18 = vpop.f32.mrb[4].mxu1  ;;  %v687_v2 = vmax.f32 %v2779_v48, 0.0  ;;  %v721_v3 = vmax.f32 %v2782_v49, 0.0 }
  0xea   :  { %v386_v19 = vpop.f32.mrb[5].mxu0  ;;  %v556_v20 = vpop.f32.mrb[5].mxu1  ;;  %v2785_v50 = vadd.f32 %v2138_v17, %v2746_v29  ;;  %v2791_v52 = vadd.f32 %v2189_v18, %v2746_v29 }
  0xeb   :  { %v2788_v51 = vadd.f32 %v2746_v29, %v386_v19  ;;  %v2794_v53 = vadd.f32 %v2746_v29, %v556_v20 }
  0xec   :  { %v690_v6 = vmax.f32 %v2785_v50, 0.0  ;;  %v724_v10 = vmax.f32 %v2791_v52, 0.0 }
  0xed   :  { %v2141_v21 = vpop.f32.mrb[6].mxu0  ;;  %v2192_v22 = vpop.f32.mrb[6].mxu1  ;;  %v689_v9 = vmax.f32 %v2788_v51, 0.0  ;;  %v723_v11 = vmax.f32 %v2794_v53, 0.0 }
  0xee   :  { %v396_v23 = vpop.f32.mrb[7].mxu0  ;;  %v566_v24 = vpop.f32.mrb[7].mxu1  ;;  %v2797_v54 = vadd.f32 %v2141_v21, %v2746_v29  ;;  %v2803_v56 = vadd.f32 %v2192_v22, %v2746_v29 }
  0xef   :  { %v2800_v55 = vadd.f32 %v2746_v29, %v396_v23  ;;  %v2806_v57 = vadd.f32 %v2746_v29, %v566_v24 }
  0xf0   :  { %v692_v12 = vmax.f32 %v2797_v54, 0.0  ;;  %v726_v14 = vmax.f32 %v2803_v56, 0.0 }
  0xf1   :  { %v2144_v25 = vpop.f32.mrb[8].mxu0  ;;  %v2195_v26 = vpop.f32.mrb[8].mxu1  ;;  %v691_v13 = vmax.f32 %v2800_v55, 0.0  ;;  %v725_v15 = vmax.f32 %v2806_v57, 0.0 }
  0xf2   :  { %v406_v27 = vpop.f32.mrb[9].mxu0  ;;  %v576_v28 = vpop.f32.mrb[9].mxu1  ;;  %v2815_v62 = vadd.f32 %v2144_v25, %v2746_v29  ;;  %v2818_v63 = vadd.f32 %v2195_v26, %v2746_v29 }
  0xf3   :  { %v2827_v4 = vadd.f32 %v2746_v29, %v406_v27  ;;  %v2830_v5 = vadd.f32 %v2746_v29, %v576_v28 }
  0xf4   :  { %v694_v18 = vmax.f32 %v2815_v62, 0.0  ;;  %v728_v19 = vmax.f32 %v2818_v63, 0.0 }
  0xf5   :  { %v2147_v30 = vpop.f32.mrb[10].mxu0  ;;  %v2198_v31 = vpop.f32.mrb[10].mxu1  ;;  %v727_v25 = vmax.f32 %v2830_v5, 0.0 }
  0xf6   :  { %v416_v34 = vpop.f32.mrb[11].mxu0  ;;  %v586_v35 = vpop.f32.mrb[11].mxu1  ;;  %v2849_v28 = vadd.f32 %v2147_v30, %v2746_v29  ;;  %v2852_v32 = vadd.f32 %v2198_v31, %v2746_v29 }
  0xf7   :  { %v2855_v37 = vadd.f32 %v2746_v29, %v416_v34  ;;  %v2858_v42 = vadd.f32 %v2746_v29, %v586_v35 }
  0xf9   :  { %v2760_v38 = vpop.f32.mrb[12].mxu0  ;;  %v2762_v39 = vpop.f32.mrb[12].mxu1 }
  0xfa   :  { %v2772_v44 = vpop.f32.mrb[13].mxu0  ;;  %v2774_v45 = vpop.f32.mrb[13].mxu1 }
  0xfb   :  { %v2910_v51 = vadd.f32 %v2746_v29, %v2774_v45 }
  0xfd   :  { %v2808_v58 = vpop.f32.mrb[14].mxu0  ;;  %v2810_v59 = vpop.f32.mrb[14].mxu1  ;;  %v731_v5 = vmax.f32 %v2910_v51, 0.0 }
  0xfe   :  { %v2820_v0 = vpop.f32.mrb[15].mxu0  ;;  %v2822_v1 = vpop.f32.mrb[15].mxu1 }
 0x101   :  { %v2156_v16 = vpop.f32.mrb[16].mxu0  ;;  %v2207_v17 = vpop.f32.mrb[16].mxu1 }
 0x102   :  { %v452_v20 = vadd.f32 %v2156_v16, %v2746_v29  ;;  %v622_v21 = vadd.f32 %v2207_v17, %v2746_v29  ;;  %v446_v22 = vpop.f32.mrb[17].mxu0  ;;  %v616_v23 = vpop.f32.mrb[17].mxu1 }
 0x103   :  { %v447_v26 = vadd.f32 %v2746_v29, %v446_v22  ;;  %v617_v27 = vadd.f32 %v2746_v29, %v616_v23 }
 0x104   :  { %v702_v33 = vmax.f32 %v452_v20, 0.0  ;;  %v736_v36 = vmax.f32 %v622_v21, 0.0 }
 0x105   :  { %v701_v43 = vmax.f32 %v447_v26, 0.0  ;;  %v735_v48 = vmax.f32 %v617_v27, 0.0  ;;  %v2159_v49 = vpop.f32.mrb[18].mxu0  ;;  %v2210_v16 = vpop.f32.mrb[18].mxu1 }
 0x106   :  { %v2860_v17 = vmax.f32 %v686_v40, %v702_v33  ;;  %v768_v22 = vmax.f32 %v720_v41, %v736_v36  ;;  %v462_v30 = vadd.f32 %v2159_v49, %v2746_v29  ;;  %v632_v31 = vadd.f32 %v2210_v16, %v2746_v29  ;;  %v456_v23 = vpop.f32.mrb[19].mxu0  ;;  %v626_v20 = vpop.f32.mrb[19].mxu1 }
 0x107   :  { %v2864_v21 = vmax.f32 %v685_v46, %v701_v43  ;;  %v767_v34 = vmax.f32 %v719_v47, %v735_v48  ;;  %v457_v8 = vadd.f32 %v2746_v29, %v456_v23  ;;  %v627_v35 = vadd.f32 %v2746_v29, %v626_v20 }
 0x108   :  { %v704_v40 = vmax.f32 %v462_v30, 0.0  ;;  %v738_v33 = vmax.f32 %v632_v31, 0.0  ;;  %v695_v41 = vmax.f32 %v2855_v37, 0.0  ;;  %v729_v36 = vmax.f32 %v2858_v42, 0.0 }
 0x109   :  { %v703_v49 = vmax.f32 %v457_v8, 0.0  ;;  %v737_v16 = vmax.f32 %v627_v35, 0.0  ;;  %v2162_v7 = vpop.f32.mrb[20].mxu0  ;;  %v2213_v46 = vpop.f32.mrb[20].mxu1  ;;  %v2878_v8 = vadd.f32 %v2760_v38, %v2746_v29  ;;  %v2423_v42 = vmov 4  }
 0x10a   :  { %v752_v43 = vmax.f32 %v688_v60, %v704_v40  ;;  %v770_v47 = vmax.f32 %v722_v61, %v738_v33  ;;  %v472_v48 = vadd.f32 %v2162_v7, %v2746_v29  ;;  %v642_v23 = vadd.f32 %v2213_v46, %v2746_v29  ;;  %v466_v20 = vpop.f32.mrb[21].mxu0  ;;  %v636_v26 = vpop.f32.mrb[21].mxu1 }
 0x10b   :  { %v751_v24 = vmax.f32 %v687_v2, %v703_v49  ;;  %v769_v27 = vmax.f32 %v721_v3, %v737_v16  ;;  %v467_v30 = vadd.f32 %v2746_v29, %v466_v20  ;;  %v637_v31 = vadd.f32 %v2746_v29, %v636_v26 }
 0x10c   :  { %v2880_v35 = vmax.f32 %v752_v43, %v768_v22  ;;  %v706_v60 = vmax.f32 %v472_v48, 0.0  ;;  %v740_v61 = vmax.f32 %v642_v23, 0.0  ;;  %v2884_v7 = vadd.f32 %v2762_v39, %v2746_v29 }
 0x10d   :  { %v2886_v40 = vmax.f32 %v751_v24, %v767_v34  ;;  %v705_v2 = vmax.f32 %v467_v30, 0.0  ;;  %v739_v3 = vmax.f32 %v637_v31, 0.0  ;;  %v2165_v33 = vpop.f32.mrb[22].mxu0  ;;  %v2216_v49 = vpop.f32.mrb[22].mxu1 }
 0x10e   :  { %v754_v26 = vmax.f32 %v690_v6, %v706_v60  ;;  %v772_v38 = vmax.f32 %v724_v10, %v740_v61  ;;  %v482_v22 = vadd.f32 %v2165_v33, %v2746_v29  ;;  %v652_v16 = vadd.f32 %v2216_v49, %v2746_v29  ;;  %v646_v46 = vpop.f32.mrb[23].mxu1  ;;  %939 = vperm.xlu0 %2270, %v2880_v35   ;;  %v476_v39 = vpop.f32.mrb[23].mxu0 }
 0x10f   :  { %v753_v24 = vmax.f32 %v689_v9, %v705_v2  ;;  %v771_v34 = vmax.f32 %v723_v11, %v739_v3  ;;  %v647_v50 = vadd.f32 %v2746_v29, %v646_v46  ;;  %830 = vperm.xlu1 %2269, %v2880_v35   ;;  %v477_v52 = vadd.f32 %v2746_v29, %v476_v39 }
 0x110   :  { %v2904_v6 = vadd.f32 %v2746_v29, %v2772_v44  ;;  %v2906_v10 = vmax.f32 %v754_v26, %v770_v47  ;;  %v708_v43 = vmax.f32 %v482_v22, 0.0  ;;  %v742_v48 = vmax.f32 %v652_v16, 0.0 }
 0x111   :  { %v2912_v53 = vmax.f32 %v753_v24, %v769_v27  ;;  %v741_v9 = vmax.f32 %v647_v50, 0.0  ;;  %v707_v11 = vmax.f32 %v477_v52, 0.0  ;;  %v2168_v23 = vpop.f32.mrb[24].mxu0  ;;  %v2219_v20 = vpop.f32.mrb[24].mxu1  ;;  %v2420_v61 = vmov 3  }
 0x112   :  { %v756_v30 = vmax.f32 %v692_v12, %v708_v43  ;;  %v774_v44 = vmax.f32 %v726_v14, %v742_v48  ;;  %v492_v47 = vadd.f32 %v2168_v23, %v2746_v29  ;;  %v662_v31 = vadd.f32 %v2219_v20, %v2746_v29  ;;  %v656_v60 = vpop.f32.mrb[25].mxu1  ;;  %2280 = vset.pattern.permute.xlu0 %v2420_v61  ;;  %v486_v45 = vpop.f32.mrb[25].mxu0 }
 0x113   :  { %v773_v27 = vmax.f32 %v725_v15, %v741_v9  ;;  %v755_v2 = vmax.f32 %v691_v13, %v707_v11  ;;  %v657_v54 = vadd.f32 %v2746_v29, %v656_v60  ;;  %v2421_v12 = vmov 2   ;;  %1161 = vperm.xlu0 %2280, %v2886_v40  }
 0x114   :  { %2271 = vset.pattern.permute.xlu1 %v2421_v12  ;;  %v487_v56 = vadd.f32 %v2746_v29, %v486_v45  ;;  %v698_v14 = vmax.f32 %v2878_v8, 0.0  ;;  %v2929_v3 = vmax.f32 %v756_v30, %v772_v38  ;;  %v710_v33 = vmax.f32 %v492_v47, 0.0 }
 0x115   :  { %v744_v49 = vmax.f32 %v662_v31, 0.0  ;;  %1052 = vperm.xlu1 %2271, %v2880_v35   ;;  %v732_v55 = vmax.f32 %v2884_v7, 0.0  ;;  %v2934_v57 = vmax.f32 %v755_v2, %v771_v34  ;;  %v743_v13 = vmax.f32 %v657_v54, 0.0  ;;  %v2171_v26 = vpop.f32.mrb[26].mxu0  ;;  %v2222_v22 = vpop.f32.mrb[26].mxu1 }
 0x116   :  { %v709_v15 = vmax.f32 %v487_v56, 0.0  ;;  %v758_v16 = vmax.f32 %v694_v18, %v710_v33  ;;  %v502_v38 = vadd.f32 %v2171_v26, %v2746_v29  ;;  %v672_v46 = vadd.f32 %v2222_v22, %v2746_v29  ;;  %v496_v39 = vpop.f32.mrb[27].mxu0  ;;  %v666_v24 = vpop.f32.mrb[27].mxu1 }
 0x117   :  { %v776_v8 = vmax.f32 %v728_v19, %v744_v49  ;;  %v775_v7 = vmax.f32 %v727_v25, %v743_v13  ;;  %v3914_v34 = vmax.f32 %v2827_v4, 0.0  ;;  %v497_v52 = vadd.f32 %v2746_v29, %v496_v39 }
 0x118   :  { %v667_v62 = vadd.f32 %v2746_v29, %v666_v24  ;;  %v697_v18 = vmax.f32 %v2904_v6, 0.0  ;;  %v2949_v63 = vmax.f32 %v758_v16, %v774_v44  ;;  %v712_v19 = vmax.f32 %v502_v38, 0.0 }
 0x119   :  { %v757_v50 = vmax.f32 %v3914_v34, %v709_v15  ;;  %v746_v43 = vmax.f32 %v672_v46, 0.0  ;;  %2272 = vset.pattern.permute.xlu1 %v2420_v61  ;;  %v2422_v48 = vmov 6   ;;  %v711_v4 = vmax.f32 %v497_v52, 0.0  ;;  %v2174_v6 = vpop.f32.mrb[28].mxu0  ;;  %v2225_v11 = vpop.f32.mrb[28].mxu1 }
 0x11a   :  { %2283 = vset.pattern.permute.xlu0 %v2422_v48  ;;  %v745_v9 = vmax.f32 %v667_v62, 0.0  ;;  %1165 = vperm.xlu1 %2272, %v2880_v35   ;;  %v3915_v23 = vmax.f32 %v2849_v28, 0.0  ;;  %v3916_v30 = vmax.f32 %v2852_v32, 0.0  ;;  %v512_v47 = vadd.f32 %v2174_v6, %v2746_v29  ;;  %v506_v31 = vpop.f32.mrb[29].mxu0  ;;  %v676_v60 = vpop.f32.mrb[29].mxu1 }
 0x11b   :  { %v2954_v25 = vmax.f32 %v757_v50, %v773_v27  ;;  %1500 = vperm.xlu0 %2283, %v2886_v40   ;;  %v682_v51 = vadd.f32 %v2225_v11, %v2746_v29  ;;  %v759_v45 = vmax.f32 %v695_v41, %v711_v4  ;;  %v507_v2 = vadd.f32 %v2746_v29, %v506_v31 }
 0x11c   :  { %v760_v20 = vmax.f32 %v3915_v23, %v712_v19  ;;  %v778_v44 = vmax.f32 %v3916_v30, %v746_v43  ;;  %v777_v27 = vmax.f32 %v729_v36, %v745_v9  ;;  %v677_v28 = vadd.f32 %v2746_v29, %v676_v60 }
 0x11d   :  { %v442_v32 = vadd.f32 %v2808_v58, %v2746_v29  ;;  %v714_v56 = vmax.f32 %v512_v47, 0.0  ;;  %v748_v33 = vmax.f32 %v682_v51, 0.0  ;;  %v437_v49 = vadd.f32 %v2746_v29, %v2820_v0  ;;  %v2177_v15 = vpop.f32.mrb[30].mxu0 }
 0x11e   :  { %v2972_v54 = vmax.f32 %v760_v20, %v776_v8  ;;  %v2976_v13 = vmax.f32 %v759_v45, %v775_v7  ;;  %v713_v37 = vmax.f32 %v507_v2, 0.0  ;;  %v747_v41 = vmax.f32 %v677_v28, 0.0  ;;  %2273 = vset.pattern.permute.xlu1 %v2423_v42  ;;  %v516_v16 = vpop.f32.mrb[31].mxu0 }
 0x11f   :  { %v3917_v36 = vmov 1   ;;  %v762_v26 = vmax.f32 %v698_v14, %v714_v56  ;;  %v780_v22 = vmax.f32 %v732_v55, %v748_v33  ;;  %1278 = vperm.xlu1 %2273, %v2880_v35   ;;  %v522_v58 = vadd.f32 %v2177_v15, %v2746_v29 }
 0x120   :  { %2286 = vset.pattern.permute.xlu0 %v3917_v36  ;;  %v761_v0 = vmax.f32 %v697_v18, %v713_v37  ;;  %v779_v8 = vmax.f32 %v731_v5, %v747_v41  ;;  %v517_v38 = vadd.f32 %v2746_v29, %v516_v16  ;;  %v700_v46 = vmax.f32 %v442_v32, 0.0  ;;  %v1932_v41 = vld [vmem:[%s3905_s3 + $0x90] sm:$0xff] }
 0x121   :  { %947 = vperm.xlu0 %2286, %v2906_v10   ;;  %v612_v39 = vadd.f32 %v2810_v59, %v2746_v29  ;;  %v2986_v24 = vmax.f32 %v762_v26, %v778_v44  ;;  %v716_v7 = vmax.f32 %v522_v58, 0.0  ;;  %v699_v14 = vmax.f32 %v437_v49, 0.0  ;;  %v2180_v52 = vpop.f32.mrb[32].mxu0  ;;  %v1948_v58 = vld [vmem:[%s3905_s3 + $0x110] sm:$0xff] }
 0x122   :  { %v607_v55 = vadd.f32 %v2746_v29, %v2822_v1  ;;  %v2990_v34 = vmax.f32 %v761_v0, %v777_v27  ;;  %v715_v50 = vmax.f32 %v517_v38, 0.0  ;;  %v2424_v18 = vmov 5   ;;  %v526_v59 = vpop.f32.mrb[33].mxu0 }
 0x123   :  { %v764_v62 = vmax.f32 %v700_v46, %v716_v7  ;;  %2274 = vset.pattern.permute.xlu1 %v2424_v18  ;;  %v532_v19 = vadd.f32 %v2180_v52, %v2746_v29  ;;  %v527_v5 = vadd.f32 %v2746_v29, %v526_v59  ;;  %v734_v1 = vmax.f32 %v612_v39, 0.0  ;;  %v1964_v39 = vld [vmem:[%s3905_s3 + $0x190] sm:$0xff] }
 0x124   :  { %v763_v43 = vmax.f32 %v699_v14, %v715_v50  ;;  %1391 = vperm.xlu1 %2274, %v2880_v35   ;;  %v733_v6 = vmax.f32 %v607_v55, 0.0  ;;  %v2425_v47 = vmov 7   ;;  %v3918_v51 = vmov 0   ;;  %v1980_v14 = vld [vmem:[%s3905_s3 + $0x210] sm:$0xff] }
 0x125   :  { %2288 = vset.pattern.permute.xlu0 %v2420_v61  ;;  %v2998_v4 = vmax.f32 %v764_v62, %v780_v22  ;;  %v718_v9 = vmax.f32 %v532_v19, 0.0  ;;  %v717_v23 = vmax.f32 %v527_v5, 0.0  ;;  %v2012_v59 = vld [vmem:[%s3905_s3 + $0x310] sm:$0xff] }
 0x126   :  { %1173 = vperm.xlu0 %2288, %v2906_v10   ;;  %v3000_v11 = vmax.f32 %v763_v43, %v779_v8 }
 0x127   :  { %v766_v20 = vmax.f32 %v718_v9, %v734_v1  ;;  %v765_v30 = vmax.f32 %v717_v23, %v733_v6 }
 0x128   :  { %2275 = vset.pattern.permute.xlu1 %v2422_v48 }
 0x129   :  { %v3005_v44 = vmax.f32 %v2860_v17, %v766_v20  ;;  %1504 = vperm.xlu1 %2275, %v2880_v35   ;;  %v3010_v29 = vmax.f32 %v2864_v21, %v765_v30 }
 0x12a   :  { %2290 = vset.pattern.permute.xlu0 %v2424_v18 }
 0x12b   :  { %1399 = vperm.xlu0 %2290, %v2906_v10  }
 0x12d   :  { %2276 = vset.pattern.permute.xlu1 %v2425_v47 }
 0x12e   :  { %1617 = vperm.xlu1 %2276, %v2880_v35  }
 0x12f   :  { %2291 = vset.pattern.permute.xlu0 %v2422_v48 }
 0x130   :  { %1512 = vperm.xlu0 %2291, %v2906_v10  }
 0x132   :  { %2277 = vset.pattern.permute.xlu1 %v3918_v51 }
 0x133   :  { %825 = vperm.xlu1 %2277, %v2886_v40  }
 0x134   :  { %2292 = vset.pattern.permute.xlu0 %v3918_v51 }
 0x135   :  { %835 = vperm.xlu0 %2292, %v2912_v53  }
 0x137   :  { %2278 = vset.pattern.permute.xlu1 %v3917_v36 }
 0x138   :  { %935 = vperm.xlu1 %2278, %v2886_v40  }
 0x139   :  { %2294 = vset.pattern.permute.xlu0 %v2421_v12 }
 0x13a   :  { %1056 = vperm.xlu0 %2294, %v2912_v53  }
 0x13c   :  { %2279 = vset.pattern.permute.xlu1 %v2421_v12 }
 0x13d   :  { %1048 = vperm.xlu1 %2279, %v2886_v40  }
 0x13e   :  { %2295 = vset.pattern.permute.xlu0 %v2420_v61 }
 0x13f   :  { %1169 = vperm.xlu0 %2295, %v2912_v53  }
 0x141   :  { %2281 = vset.pattern.permute.xlu1 %v2423_v42 }
 0x142   :  { %1274 = vperm.xlu1 %2281, %v2886_v40  }
 0x143   :  { %2297 = vset.pattern.permute.xlu0 %v2424_v18 }
 0x144   :  { %1395 = vperm.xlu0 %2297, %v2912_v53  }
 0x146   :  { %2282 = vset.pattern.permute.xlu1 %v2424_v18 }
 0x147   :  { %1387 = vperm.xlu1 %2282, %v2886_v40  }
 0x148   :  { %2301 = vset.pattern.permute.xlu0 %v3917_v36 }
 0x149   :  { %955 = vperm.xlu0 %2301, %v2929_v3  }
 0x14b   :  { %2284 = vset.pattern.permute.xlu1 %v2425_v47 }
 0x14c   :  { %1613 = vperm.xlu1 %2284, %v2886_v40  }
 0x14d   :  { %2303 = vset.pattern.permute.xlu0 %v2420_v61 }
 0x14e   :  { %1181 = vperm.xlu0 %2303, %v2929_v3  }
 0x150   :  { %2285 = vset.pattern.permute.xlu1 %v3918_v51 }
 0x151   :  { %840 = vperm.xlu1 %2285, %v2906_v10  }
 0x152   :  { %2304 = vset.pattern.permute.xlu0 %v2423_v42 }
 0x153   :  { %1294 = vperm.xlu0 %2304, %v2929_v3  }
 0x155   :  { %2287 = vset.pattern.permute.xlu1 %v2421_v12 }
 0x156   :  { %1060 = vperm.xlu1 %2287, %v2906_v10  }
 0x157   :  { %2306 = vset.pattern.permute.xlu0 %v3918_v51 }
 0x158   :  { %845 = vperm.xlu0 %2306, %v2934_v57  }
 0x15a   :  { %2289 = vset.pattern.permute.xlu1 %v2423_v42 }
 0x15b   :  { %1286 = vperm.xlu1 %2289, %v2906_v10  }
 0x15c   :  { %2308 = vset.pattern.permute.xlu0 %v2421_v12 }
 0x15d   :  { %1064 = vperm.xlu0 %2308, %v2934_v57  }
 0x15f   :  { %2293 = vset.pattern.permute.xlu1 %v3917_v36 }
 0x160   :  { %943 = vperm.xlu1 %2293, %v2912_v53  }
 0x161   :  { %2314 = vset.pattern.permute.xlu0 %v3917_v36 }
 0x162   :  { %963 = vperm.xlu0 %2314, %v2949_v63  }
 0x164   :  { %2296 = vset.pattern.permute.xlu1 %v2423_v42 }
 0x165   :  { %1282 = vperm.xlu1 %2296, %v2912_v53  }
 0x166   :  { %2316 = vset.pattern.permute.xlu0 %v2420_v61 }
 0x167   :  { %1189 = vperm.xlu0 %2316, %v2949_v63  }
 0x169   :  { %2298 = vset.pattern.permute.xlu1 %v2422_v48 }
 0x16a   :  { %1508 = vperm.xlu1 %2298, %v2912_v53  }
 0x16b   :  { %2318 = vset.pattern.permute.xlu0 %v2424_v18 }
 0x16c   :  { %1415 = vperm.xlu0 %2318, %v2949_v63  }
 0x16e   :  { %2299 = vset.pattern.permute.xlu1 %v2425_v47 }
 0x16f   :  { %1621 = vperm.xlu1 %2299, %v2912_v53  }
 0x170   :  { %2321 = vset.pattern.permute.xlu0 %v3918_v51 }
 0x171   :  { %855 = vperm.xlu0 %2321, %v2954_v25  }
 0x173   :  { %2300 = vset.pattern.permute.xlu1 %v3918_v51 }
 0x174   :  { %850 = vperm.xlu1 %2300, %v2929_v3  }
 0x175   :  { %2323 = vset.pattern.permute.xlu0 %v2421_v12 }
 0x176   :  { %1072 = vperm.xlu0 %2323, %v2954_v25  }
 0x178   :  { %2302 = vset.pattern.permute.xlu1 %v2421_v12 }
 0x179   :  { %1068 = vperm.xlu1 %2302, %v2929_v3  }
 0x17a   :  { %2325 = vset.pattern.permute.xlu0 %v2423_v42 }
 0x17b   :  { %1298 = vperm.xlu0 %2325, %v2954_v25  }
 0x17d   :  { %2305 = vset.pattern.permute.xlu1 %v2424_v18 }
 0x17e   :  { %1407 = vperm.xlu1 %2305, %v2929_v3  }
 0x17f   :  { %2327 = vset.pattern.permute.xlu0 %v2422_v48 }
 0x180   :  { %1524 = vperm.xlu0 %2327, %v2954_v25  }
 0x182   :  { %2307 = vset.pattern.permute.xlu1 %v3917_v36 }
 0x183   :  { %951 = vperm.xlu1 %2307, %v2934_v57  }
 0x184   :  { %2328 = vset.pattern.permute.xlu0 %v2425_v47 }
 0x185   :  { %1637 = vperm.xlu0 %2328, %v2954_v25  }
 0x187   :  { %2309 = vset.pattern.permute.xlu1 %v2420_v61 }
 0x188   :  { %1177 = vperm.xlu1 %2309, %v2934_v57  }
 0x189   :  { %2330 = vset.pattern.permute.xlu0 %v3917_v36 }
 0x18a   :  { %971 = vperm.xlu0 %2330, %v2972_v54  }
 0x18c   :  { %2310 = vset.pattern.permute.xlu1 %v2423_v42 }
 0x18d   :  { %1290 = vperm.xlu1 %2310, %v2934_v57   ;;  %v3092_v17 = vpop.permute.xlu0 %939 }
 0x18e   :  { %2337 = vset.pattern.permute.xlu0 %v3918_v51  ;;  %v3094_v21 = vpop.permute.xlu1 %830 }
 0x18f   :  { %865 = vperm.xlu0 %2337, %v2976_v13  }
 0x191   :  { %2311 = vset.pattern.permute.xlu1 %v2424_v18 }
 0x192   :  { %1403 = vperm.xlu1 %2311, %v2934_v57   ;;  %v3102_v40 = vpop.permute.xlu0 %1161 }
 0x193   :  { %2339 = vset.pattern.permute.xlu0 %v2421_v12  ;;  %v1218_v55 = vmul.f32 %v1964_v39, %v3102_v40 }
 0x194   :  { %1080 = vperm.xlu0 %2339, %v2976_v13   ;;  %v3100_v35 = vpop.permute.xlu1 %1052 }
 0x196   :  { %2312 = vset.pattern.permute.xlu1 %v2422_v48 }
 0x197   :  { %1516 = vperm.xlu1 %2312, %v2934_v57  }
 0x198   :  { %2346 = vset.pattern.permute.xlu0 %v3917_v36 }
 0x199   :  { %979 = vperm.xlu0 %2346, %v2986_v24   ;;  %v3108_v53 = vpop.permute.xlu1 %1165 }
 0x19a   :  { %v3110_v31 = vpop.permute.xlu0 %1500 }
 0x19b   :  { %2313 = vset.pattern.permute.xlu1 %v3918_v51  ;;  %v1557_v6 = vmul.f32 %v2012_v59, %v3110_v31  ;;  %v802_v31 = vld [vmem:[%s3905_s3 + $0x28] sm:$0xff]  ;;  %v801_v59 = vld [vmem:[%s3905_s3 + $0x20] sm:$0xff] }
 0x19c   :  { %860 = vperm.xlu1 %2313, %v2949_v63  }
 0x19d   :  { %2349 = vset.pattern.permute.xlu0 %v2423_v42 }
 0x19e   :  { %1318 = vperm.xlu0 %2349, %v2986_v24   ;;  %v3116_v60 = vpop.permute.xlu1 %1278 }
 0x1a0   :  { %v3118_v45 = vpop.permute.xlu0 %947  ;;  %2315 = vset.pattern.permute.xlu1 %v2421_v12 }
 0x1a1   :  { %1076 = vperm.xlu1 %2315, %v2949_v63  }
 0x1a2   :  { %2351 = vset.pattern.permute.xlu0 %v2422_v48 }
 0x1a3   :  { %1544 = vperm.xlu0 %2351, %v2986_v24   ;;  %v3124_v27 = vpop.permute.xlu1 %1391 }
 0x1a5   :  { %v3126_v2 = vpop.permute.xlu0 %1173  ;;  %2317 = vset.pattern.permute.xlu1 %v2423_v42 }
 0x1a6   :  { %1302 = vperm.xlu1 %2317, %v2949_v63  }
 0x1a7   :  { %2352 = vset.pattern.permute.xlu0 %v3918_v51 }
 0x1a8   :  { %875 = vperm.xlu0 %2352, %v2990_v34   ;;  %v3132_v28 = vpop.permute.xlu1 %1504 }
 0x1aa   :  { %v3134_v32 = vpop.permute.xlu0 %1399  ;;  %2319 = vset.pattern.permute.xlu1 %v2422_v48 }
 0x1ab   :  { %1528 = vperm.xlu1 %2319, %v2949_v63  }
 0x1ac   :  { %2355 = vset.pattern.permute.xlu0 %v2420_v61 }
 0x1ad   :  { %1201 = vperm.xlu0 %2355, %v2990_v34   ;;  %v3140_v56 = vpop.permute.xlu1 %1617 }
 0x1af   :  { %v3142_v33 = vpop.permute.xlu0 %1512  ;;  %2320 = vset.pattern.permute.xlu1 %v2425_v47 }
 0x1b0   :  { %1641 = vperm.xlu1 %2320, %v2949_v63   ;;  %v799_v63 = vld [vmem:[%s3905_s3 + $0x10] sm:$0xff] }
 0x1b1   :  { %2356 = vset.pattern.permute.xlu0 %v2423_v42 }
 0x1b2   :  { %1314 = vperm.xlu0 %2356, %v2990_v34   ;;  %v826_v37 = vpop.permute.xlu1 %825 }
 0x1b3   :  { %v895_v16 = vmul.f32 %v826_v37, %v799_v63 }
 0x1b4   :  { %v3148_v49 = vpop.permute.xlu0 %835  ;;  %2322 = vset.pattern.permute.xlu1 %v3917_v36 }
 0x1b5   :  { %959 = vperm.xlu1 %2322, %v2954_v25  }
 0x1b6   :  { %2358 = vset.pattern.permute.xlu0 %v2422_v48 }
 0x1b7   :  { %1540 = vperm.xlu0 %2358, %v2990_v34   ;;  %v936_v26 = vpop.permute.xlu1 %935 }
 0x1b8   :  { %v992_v22 = vmul.f32 %v1932_v41, %v936_v26  ;;  %v1935_v41 = vld [vmem:[%s3905_s3 + $0xa8] sm:$0xff] }
 0x1b9   :  { %v3157_v15 = vpop.permute.xlu0 %1056  ;;  %2324 = vset.pattern.permute.xlu1 %v2420_v61 }
 0x1ba   :  { %1185 = vperm.xlu1 %2324, %v2954_v25   ;;  %v1008_v38 = vadd.f32 %v992_v22, %v895_v16  ;;  %v1951_v22 = vld [vmem:[%s3905_s3 + $0x128] sm:$0xff] }
 0x1bb   :  { %2361 = vset.pattern.permute.xlu0 %v3917_v36  ;;  %v1967_v16 = vld [vmem:[%s3905_s3 + $0x1a8] sm:$0xff] }
 0x1bc   :  { %987 = vperm.xlu0 %2361, %v2998_v4   ;;  %v1049_v8 = vpop.permute.xlu1 %1048  ;;  %v1221_v39 = vmul.f32 %v1967_v16, %v3126_v2  ;;  %v2015_v2 = vld [vmem:[%s3905_s3 + $0x328] sm:$0xff] }
 0x1bd   :  { %v1105_v46 = vmul.f32 %v1948_v58, %v1049_v8  ;;  %v995_v58 = vmul.f32 %v1935_v41, %v3118_v45  ;;  %v1983_v45 = vld [vmem:[%s3905_s3 + $0x228] sm:$0xff] }
 0x1be   :  { %v3169_v0 = vpop.permute.xlu0 %1169  ;;  %2326 = vset.pattern.permute.xlu1 %v2424_v18 }
 0x1bf   :  { %v1121_v7 = vadd.f32 %v1105_v46, %v1008_v38  ;;  %1411 = vperm.xlu1 %2326, %v2954_v25   ;;  %v1996_v25 = vld [vmem:[%s3905_s3 + $0x290] sm:$0xff] }
 0x1c0   :  { %2363 = vset.pattern.permute.xlu0 %v2420_v61 }
 0x1c1   :  { %1213 = vperm.xlu0 %2363, %v2998_v4   ;;  %v1275_v52 = vpop.permute.xlu1 %1274  ;;  %v1234_v62 = vadd.f32 %v1218_v55, %v1121_v7  ;;  %v1999_v55 = vld [vmem:[%s3905_s3 + $0x2a8] sm:$0xff] }
 0x1c2   :  { %v1331_v19 = vmul.f32 %v1980_v14, %v1275_v52 }
 0x1c3   :  { %v3182_v50 = vpop.permute.xlu0 %1395  ;;  %2329 = vset.pattern.permute.xlu1 %v3918_v51 }
 0x1c4   :  { %870 = vperm.xlu1 %2329, %v2972_v54   ;;  %v1347_v5 = vadd.f32 %v1331_v19, %v1234_v62 }
 0x1c5   :  { %2366 = vset.pattern.permute.xlu0 %v2422_v48 }
 0x1c6   :  { %1552 = vperm.xlu0 %2366, %v2998_v4   ;;  %v1388_v43 = vpop.permute.xlu1 %1387 }
 0x1c7   :  { %v1444_v9 = vmul.f32 %v1996_v25, %v1388_v43  ;;  %v1447_v25 = vmul.f32 %v1999_v55, %v3134_v32 }
 0x1c8   :  { %v3194_v1 = vpop.permute.xlu0 %955  ;;  %2331 = vset.pattern.permute.xlu1 %v2421_v12 }
 0x1c9   :  { %v1460_v23 = vadd.f32 %v1444_v9, %v1347_v5  ;;  %1084 = vperm.xlu1 %2331, %v2972_v54   ;;  %v1934_v5 = vld [vmem:[%s3905_s3 + $0xa0] sm:$0xff]  ;;  %v1560_v9 = vmul.f32 %v2015_v2, %v3142_v33 }
 0x1ca   :  { %2367 = vset.pattern.permute.xlu0 %v3918_v51 }
 0x1cb   :  { %885 = vperm.xlu0 %2367, %v3000_v11   ;;  %v3201_v20 = vadd.f32 %v1557_v6, %v1460_v23  ;;  %v3203_v30 = vpop.permute.xlu1 %1613  ;;  %v1950_v6 = vld [vmem:[%s3905_s3 + $0x120] sm:$0xff] }
 0x1cd   :  { %v3205_v40 = vpop.permute.xlu0 %1181  ;;  %2332 = vset.pattern.permute.xlu1 %v2420_v61 }
 0x1ce   :  { %1197 = vperm.xlu1 %2332, %v2972_v54  }
 0x1cf   :  { %820 = vperm.xlu0 %2367, %v3005_v44  }
 0x1d0   :  { %v841_v37 = vpop.permute.xlu1 %840 }
 0x1d1   :  { %v898_v26 = vmul.f32 %v841_v37, %v802_v31  ;;  %v897_v37 = vmul.f32 %v3148_v49, %v801_v59  ;;  %v1982_v49 = vld [vmem:[%s3905_s3 + $0x220] sm:$0xff] }
 0x1d2   :  { %2333 = vset.pattern.permute.xlu1 %v2423_v42  ;;  %v3219_v63 = vpop.permute.xlu0 %1294 }
 0x1d3   :  { %2375 = vset.pattern.permute.xlu0 %v2421_v12  ;;  %1310 = vperm.xlu1 %2333, %v2972_v54   ;;  %v1011_v38 = vadd.f32 %v995_v58, %v898_v26  ;;  %v1966_v26 = vld [vmem:[%s3905_s3 + $0x1a0] sm:$0xff] }
 0x1d4   :  { %1044 = vperm.xlu0 %2375, %v3005_v44   ;;  %v1220_v16 = vmul.f32 %v1966_v26, %v3169_v0 }
 0x1d5   :  { %v1061_v8 = vpop.permute.xlu1 %1060 }
 0x1d6   :  { %v1108_v46 = vmul.f32 %v1951_v22, %v1061_v8  ;;  %v1107_v22 = vmul.f32 %v1950_v6, %v3157_v15  ;;  %v1969_v6 = vld [vmem:[%s3905_s3 + $0x1b8] sm:$0xff] }
 0x1d7   :  { %2334 = vset.pattern.permute.xlu1 %v2424_v18  ;;  %v3237_v14 = vpop.permute.xlu0 %845  ;;  %v1223_v26 = vmul.f32 %v1969_v6, %v3205_v40  ;;  %v803_v40 = vld [vmem:[%s3905_s3 + $0x30] sm:$0xff]  ;;  %v806_v6 = vld [vmem:[%s3905_s3 + $0x48] sm:$0xff] }
 0x1d8   :  { %2376 = vset.pattern.permute.xlu0 %v2420_v61  ;;  %v1124_v7 = vadd.f32 %v1108_v46, %v1011_v38  ;;  %1423 = vperm.xlu1 %2334, %v2972_v54   ;;  %v1998_v46 = vld [vmem:[%s3905_s3 + $0x2a0] sm:$0xff] }
 0x1d9   :  { %1157 = vperm.xlu0 %2376, %v3005_v44  }
 0x1da   :  { %v1237_v52 = vadd.f32 %v1221_v39, %v1124_v7  ;;  %v1287_v62 = vpop.permute.xlu1 %1286 }
 0x1db   :  { %v1334_v19 = vmul.f32 %v1983_v45, %v1287_v62 }
 0x1dc   :  { %2335 = vset.pattern.permute.xlu1 %v2422_v48  ;;  %v3260_v23 = vpop.permute.xlu0 %1064 }
 0x1dd   :  { %2377 = vset.pattern.permute.xlu0 %v2423_v42  ;;  %v1350_v43 = vadd.f32 %v1334_v19, %v1237_v52  ;;  %1536 = vperm.xlu1 %2335, %v2972_v54   ;;  %v804_v19 = vld [vmem:[%s3905_s3 + $0x38] sm:$0xff] }
 0x1de   :  { %1270 = vperm.xlu0 %2377, %v3005_v44  }
 0x1df   :  { %v1463_v32 = vadd.f32 %v1447_v25, %v1350_v43  ;;  %v944_v31 = vpop.permute.xlu1 %943  ;;  %v1937_v25 = vld [vmem:[%s3905_s3 + $0xb8] sm:$0xff] }
 0x1e0   :  { %v994_v41 = vmul.f32 %v1934_v5, %v944_v31  ;;  %v1953_v43 = vld [vmem:[%s3905_s3 + $0x138] sm:$0xff]  ;;  %v997_v5 = vmul.f32 %v1937_v25, %v3194_v1 }
 0x1e1   :  { %2336 = vset.pattern.permute.xlu1 %v2425_v47  ;;  %v3269_v33 = vadd.f32 %v1560_v9, %v1463_v32  ;;  %v3280_v39 = vpop.permute.xlu0 %963 }
 0x1e2   :  { %2380 = vset.pattern.permute.xlu0 %v2425_v47  ;;  %v1010_v58 = vadd.f32 %v994_v41, %v897_v37  ;;  %1649 = vperm.xlu1 %2336, %v2972_v54   ;;  %v1446_v54 = vmul.f32 %v1998_v46, %v3182_v50  ;;  %v1985_v41 = vld [vmem:[%s3905_s3 + $0x238] sm:$0xff] }
 0x1e3   :  { %1609 = vperm.xlu0 %2380, %v3005_v44  }
 0x1e4   :  { %v1123_v8 = vadd.f32 %v1107_v22, %v1010_v58  ;;  %v1283_v38 = vpop.permute.xlu1 %1282  ;;  %v1336_v22 = vmul.f32 %v1985_v41, %v3219_v63  ;;  %v1936_v63 = vld [vmem:[%s3905_s3 + $0xb0] sm:$0xff]  ;;  %v1955_v41 = vld [vmem:[%s3905_s3 + $0x148] sm:$0xff] }
 0x1e5   :  { %v1333_v7 = vmul.f32 %v1982_v49, %v1283_v38  ;;  %v1952_v38 = vld [vmem:[%s3905_s3 + $0x130] sm:$0xff] }
 0x1e6   :  { %v1236_v15 = vadd.f32 %v1220_v16, %v1123_v8  ;;  %2338 = vset.pattern.permute.xlu1 %v3917_v36  ;;  %v3292_v52 = vpop.permute.xlu0 %1189 }
 0x1e7   :  { %2381 = vset.pattern.permute.xlu0 %v3918_v51  ;;  %967 = vperm.xlu1 %2338, %v2976_v13  }
 0x1e8   :  { %815 = vperm.xlu0 %2381, %v3010_v29   ;;  %v1349_v0 = vadd.f32 %v1333_v7, %v1236_v15  ;;  %v899_v7 = vmul.f32 %v3237_v14, %v803_v40 }
 0x1e9   :  { %v3287_v45 = vpop.permute.xlu1 %1508 }
 0x1ea   :  { %v3289_v55 = vadd.f32 %v1446_v54, %v1349_v0 }
 0x1eb   :  { %2340 = vset.pattern.permute.xlu1 %v2420_v61  ;;  %v3302_v50 = vpop.permute.xlu0 %1415 }
 0x1ec   :  { %2382 = vset.pattern.permute.xlu0 %v3917_v36  ;;  %1193 = vperm.xlu1 %2340, %v2976_v13  }
 0x1ed   :  { %927 = vperm.xlu0 %2382, %v3010_v29  }
 0x1ee   :  { %v3297_v62 = vpop.permute.xlu1 %1621 }
 0x1f0   :  { %2341 = vset.pattern.permute.xlu1 %v2423_v42  ;;  %v3319_v9 = vpop.permute.xlu0 %855 }
 0x1f1   :  { %2387 = vset.pattern.permute.xlu0 %v2424_v18  ;;  %1306 = vperm.xlu1 %2341, %v2976_v13  }
 0x1f2   :  { %1379 = vperm.xlu0 %2387, %v3010_v29  }
 0x1f3   :  { %v851_v2 = vpop.permute.xlu1 %850 }
 0x1f4   :  { %v900_v59 = vmul.f32 %v851_v2, %v804_v19 }
 0x1f5   :  { %2342 = vset.pattern.permute.xlu1 %v2424_v18  ;;  %v3332_v58 = vpop.permute.xlu0 %1072 }
 0x1f6   :  { %2388 = vset.pattern.permute.xlu0 %v2422_v48  ;;  %1419 = vperm.xlu1 %2342, %v2976_v13   ;;  %v1013_v31 = vadd.f32 %v997_v5, %v900_v59 }
 0x1f7   :  { %1492 = vperm.xlu0 %2388, %v3010_v29  }
 0x1f8   :  { %v1069_v32 = vpop.permute.xlu1 %1068 }
 0x1f9   :  { %v1110_v37 = vmul.f32 %v1953_v43, %v1069_v32 }
 0x1fa   :  { %2343 = vset.pattern.permute.xlu1 %v2422_v48  ;;  %v3353_v15 = vpop.permute.xlu0 %1298 }
 0x1fb   :  { %1520 = vperm.xlu0 %2388, %v2929_v3   ;;  %v1126_v1 = vadd.f32 %v1110_v37, %v1013_v31  ;;  %1532 = vperm.xlu1 %2343, %v2976_v13   ;;  %v1939_v37 = vld [vmem:[%s3905_s3 + $0xc8] sm:$0xff] }
 0x1fd   :  { %v1239_v49 = vadd.f32 %v1223_v26, %v1126_v1  ;;  %v3334_v16 = vpop.permute.xlu1 %1407  ;;  %v999_v26 = vmul.f32 %v1939_v37, %v3280_v39  ;;  %v1971_v1 = vld [vmem:[%s3905_s3 + $0x1c8] sm:$0xff] }
 0x1fe   :  { %v1987_v39 = vld [vmem:[%s3905_s3 + $0x248] sm:$0xff] }
 0x1ff   :  { %2389 = vset.pattern.permute.xlu0 %v2425_v47  ;;  %v3338_v8 = vadd.f32 %v1336_v22, %v1239_v49  ;;  %2344 = vset.pattern.permute.xlu1 %v2425_v47  ;;  %v3362_v25 = vpop.permute.xlu0 %1524  ;;  %v2019_v37 = vld [vmem:[%s3905_s3 + $0x348] sm:$0xff] }
 0x200   :  { %1657 = vperm.xlu0 %2389, %v2986_v24   ;;  %1645 = vperm.xlu1 %2344, %v2976_v13   ;;  %v1109_v13 = vmul.f32 %v1952_v38, %v3260_v23  ;;  %v1225_v38 = vmul.f32 %v1971_v1, %v3292_v52 }
 0x202   :  { %v952_v46 = vpop.permute.xlu1 %951 }
 0x203   :  { %v996_v54 = vmul.f32 %v1936_v63, %v952_v46 }
 0x204   :  { %1665 = vperm.xlu0 %2389, %v2998_v4   ;;  %2345 = vset.pattern.permute.xlu1 %v3918_v51  ;;  %v3369_v59 = vpop.permute.xlu0 %1637 }
 0x205   :  { %v1012_v0 = vadd.f32 %v996_v54, %v899_v7  ;;  %880 = vperm.xlu1 %2345, %v2986_v24   ;;  %v2003_v7 = vld [vmem:[%s3905_s3 + $0x2c8] sm:$0xff] }
 0x206   :  { %v1451_v52 = vmul.f32 %v2003_v7, %v3302_v50  ;;  %v2035_v50 = vld [vmem:[%s3905_s3 + $0x3c8] sm:$0xff] }
 0x207   :  { %v3358_v19 = vadd.f32 %v1109_v13, %v1012_v0  ;;  %v3360_v2 = vpop.permute.xlu1 %1177 }
 0x209   :  { %2347 = vset.pattern.permute.xlu1 %v2421_v12  ;;  %v3376_v43 = vpop.permute.xlu0 %971 }
 0x20a   :  { %1092 = vperm.xlu1 %2347, %v2986_v24  }
 0x20c   :  { %v3366_v14 = vpop.permute.xlu1 %1290 }
 0x20e   :  { %2348 = vset.pattern.permute.xlu1 %v2420_v61  ;;  %v3385_v32 = vpop.permute.xlu0 %865 }
 0x20f   :  { %1205 = vperm.xlu1 %2348, %v2986_v24  }
 0x211   :  { %v3372_v23 = vpop.permute.xlu1 %1403 }
 0x213   :  { %2350 = vset.pattern.permute.xlu1 %v2424_v18  ;;  %v3399_v49 = vpop.permute.xlu0 %1080 }
 0x214   :  { %1431 = vperm.xlu1 %2350, %v2986_v24  }
 0x216   :  { %v3378_v5 = vpop.permute.xlu1 %1516 }
 0x218   :  { %2353 = vset.pattern.permute.xlu1 %v3917_v36 }
 0x219   :  { %975 = vperm.xlu1 %2353, %v2990_v34  }
 0x21b   :  { %v861_v31 = vpop.permute.xlu1 %860 }
 0x21c   :  { %v902_v24 = vmul.f32 %v861_v31, %v806_v6  ;;  %v3410_v6 = vpop.permute.xlu0 %979 }
 0x21d   :  { %2354 = vset.pattern.permute.xlu1 %v2421_v12 }
 0x21e   :  { %1088 = vperm.xlu1 %2354, %v2990_v34   ;;  %v1015_v40 = vadd.f32 %v999_v26, %v902_v24 }
 0x220   :  { %v1077_v22 = vpop.permute.xlu1 %1076  ;;  %v3419_v1 = vpop.permute.xlu0 %1318 }
 0x221   :  { %v1112_v63 = vmul.f32 %v1955_v41, %v1077_v22 }
 0x222   :  { %2357 = vset.pattern.permute.xlu1 %v2424_v18 }
 0x223   :  { %v1128_v46 = vadd.f32 %v1112_v63, %v1015_v40  ;;  %1427 = vperm.xlu1 %2357, %v2990_v34   ;;  %v805_v63 = vld [vmem:[%s3905_s3 + $0x40] sm:$0xff] }
 0x225   :  { %v1241_v54 = vadd.f32 %v1225_v38, %v1128_v46  ;;  %v1303_v13 = vpop.permute.xlu1 %1302  ;;  %v3433_v46 = vpop.permute.xlu0 %1544 }
 0x226   :  { %v1338_v0 = vmul.f32 %v1987_v39, %v1303_v13  ;;  %v1954_v39 = vld [vmem:[%s3905_s3 + $0x140] sm:$0xff] }
 0x227   :  { %2359 = vset.pattern.permute.xlu1 %v2425_v47 }
 0x228   :  { %v1354_v31 = vadd.f32 %v1338_v0, %v1241_v54  ;;  %1653 = vperm.xlu1 %2359, %v2990_v34   ;;  %v901_v54 = vmul.f32 %v3319_v9, %v805_v63  ;;  %v1111_v0 = vmul.f32 %v1954_v39, %v3332_v58 }
 0x22a   :  { %v1467_v24 = vadd.f32 %v1451_v52, %v1354_v31  ;;  %v1529_v41 = vpop.permute.xlu1 %1528  ;;  %v1970_v31 = vld [vmem:[%s3905_s3 + $0x1c0] sm:$0xff] }
 0x22b   :  { %v1564_v26 = vmul.f32 %v2019_v37, %v1529_v41  ;;  %v1986_v37 = vld [vmem:[%s3905_s3 + $0x240] sm:$0xff] }
 0x22c   :  { %2360 = vset.pattern.permute.xlu1 %v3918_v51  ;;  %v1938_v51 = vld [vmem:[%s3905_s3 + $0xc0] sm:$0xff]  ;;  %v1337_v58 = vmul.f32 %v1986_v37, %v3353_v15 }
 0x22d   :  { %v1580_v22 = vadd.f32 %v1564_v26, %v1467_v24  ;;  %890 = vperm.xlu1 %2360, %v2998_v4   ;;  %v3448_v24 = vpop.permute.xlu0 %875  ;;  %v2034_v15 = vld [vmem:[%s3905_s3 + $0x3c0] sm:$0xff] }
 0x22f   :  { %v1642_v40 = vpop.permute.xlu1 %1641 }
 0x230   :  { %v1677_v34 = vmul.f32 %v2035_v50, %v1642_v40  ;;  %v2002_v50 = vld [vmem:[%s3905_s3 + $0x2c0] sm:$0xff] }
 0x231   :  { %2362 = vset.pattern.permute.xlu1 %v2421_v12  ;;  %v2018_v40 = vld [vmem:[%s3905_s3 + $0x340] sm:$0xff] }
 0x232   :  { %v1693_v38 = vadd.f32 %v1677_v34, %v1580_v22  ;;  %1100 = vperm.xlu1 %2362, %v2998_v4  }
 0x234   :  { %v960_v7 = vpop.permute.xlu1 %959 }
 0x235   :  { %v998_v13 = vmul.f32 %v1938_v51, %v960_v7  ;;  %v3459_v51 = vpop.permute.xlu0 %1201  ;;  %v1941_v7 = vld [vmem:[%s3905_s3 + $0xd8] sm:$0xff] }
 0x236   :  { %2364 = vset.pattern.permute.xlu1 %v2423_v42  ;;  %v1001_v37 = vmul.f32 %v1941_v7, %v3376_v43  ;;  %v1989_v7 = vld [vmem:[%s3905_s3 + $0x258] sm:$0xff] }
 0x237   :  { %v1014_v52 = vadd.f32 %v998_v13, %v901_v54  ;;  %1326 = vperm.xlu1 %2364, %v2998_v4   ;;  %v808_v13 = vld [vmem:[%s3905_s3 + $0x58] sm:$0xff] }
 0x239   :  { %v1127_v41 = vadd.f32 %v1111_v0, %v1014_v52  ;;  %v1186_v9 = vpop.permute.xlu1 %1185  ;;  %v1676_v0 = vmul.f32 %v2034_v15, %v3369_v59  ;;  %v1723_v59 = vsel %vm1700_vm2, %v1693_v38, 0.0 }
 0x23a   :  { %v1224_v26 = vmul.f32 %v1970_v31, %v1186_v9  ;;  %v3475_v9 = vpop.permute.xlu0 %1314 }
 0x23b   :  { %2365 = vset.pattern.permute.xlu1 %v2424_v18 }
 0x23c   :  { %v1240_v22 = vadd.f32 %v1224_v26, %v1127_v41  ;;  %1439 = vperm.xlu1 %2365, %v2998_v4   ;;  %v1563_v4 = vmul.f32 %v2018_v40, %v3362_v25 }
 0x23e   :  { %v1353_v34 = vadd.f32 %v1337_v58, %v1240_v22  ;;  %v1412_v63 = vpop.permute.xlu1 %1411  ;;  %v1957_v58 = vld [vmem:[%s3905_s3 + $0x158] sm:$0xff] }
 0x23f   :  { %v1450_v39 = vmul.f32 %v2002_v50, %v1412_v63 }
 0x240   :  { %2368 = vset.pattern.permute.xlu1 %v3917_v36 }
 0x241   :  { %v1466_v54 = vadd.f32 %v1450_v39, %v1353_v34  ;;  %983 = vperm.xlu1 %2368, %v3000_v11   ;;  %v3487_v34 = vpop.permute.xlu0 %1540  ;;  %v1973_v39 = vld [vmem:[%s3905_s3 + $0x1d8] sm:$0xff] }
 0x243   :  { %v1579_v52 = vadd.f32 %v1563_v4, %v1466_v54  ;;  %v871_v31 = vpop.permute.xlu1 %870 }
 0x244   :  { %v904_v41 = vmul.f32 %v871_v31, %v808_v13  ;;  %v2005_v31 = vld [vmem:[%s3905_s3 + $0x2d8] sm:$0xff] }
 0x245   :  { %v1692_v25 = vadd.f32 %v1676_v0, %v1579_v52  ;;  %2369 = vset.pattern.permute.xlu1 %v2421_v12  ;;  %v3498_v54 = vpop.permute.xlu0 %987 }
 0x246   :  { %v1017_v26 = vadd.f32 %v1001_v37, %v904_v41  ;;  %1096 = vperm.xlu1 %2369, %v3000_v11  }
 0x247   :  { %v1722_v22 = vsel %vm1700_vm2, %v1692_v25, 0.0 }
 0x248   :  { %v1085_v50 = vpop.permute.xlu1 %1084  ;;  %v3484_v43 = vadd.f32 %v1723_v59, %v1722_v22 }
 0x249   :  { %v1114_v40 = vmul.f32 %v1957_v58, %v1085_v50  ;;  %v3505_v37 = vpop.permute.xlu0 %1213  ;;  %v2021_v58 = vld [vmem:[%s3905_s3 + $0x358] sm:$0xff] }
 0x24a   :  { %2370 = vset.pattern.permute.xlu1 %v2420_v61 }
 0x24b   :  { %v1130_v63 = vadd.f32 %v1114_v40, %v1017_v26  ;;  %1209 = vperm.xlu1 %2370, %v3000_v11  }
 0x24d   :  { %v1198_v15 = vpop.permute.xlu1 %1197  ;;  %v3512_v22 = vpop.permute.xlu0 %1552 }
 0x24e   :  { %v1227_v4 = vmul.f32 %v1973_v39, %v1198_v15 }
 0x24f   :  { %2371 = vset.pattern.permute.xlu1 %v2423_v42 }
 0x250   :  { %v1243_v38 = vadd.f32 %v1227_v4, %v1130_v63  ;;  %1322 = vperm.xlu1 %2371, %v3000_v11   ;;  %v2037_v63 = vld [vmem:[%s3905_s3 + $0x3d8] sm:$0xff] }
 0x251   :  { %v3519_v4 = vpop.permute.xlu0 %885 }
 0x252   :  { %v1311_v13 = vpop.permute.xlu1 %1310 }
 0x253   :  { %v1340_v0 = vmul.f32 %v1989_v7, %v1311_v13  ;;  %v1956_v13 = vld [vmem:[%s3905_s3 + $0x150] sm:$0xff] }
 0x254   :  { %2372 = vset.pattern.permute.xlu1 %v2424_v18 }
 0x255   :  { %v1356_v52 = vadd.f32 %v1340_v0, %v1243_v38  ;;  %1435 = vperm.xlu1 %2372, %v3000_v11   ;;  %v807_v38 = vld [vmem:[%s3905_s3 + $0x50] sm:$0xff] }
 0x257   :  { %v1424_v41 = vpop.permute.xlu1 %1423 }
 0x258   :  { %v1453_v25 = vmul.f32 %v2005_v31, %v1424_v41  ;;  %v3535_v41 = vpop.permute.xlu0 %820 }
 0x259   :  { %2373 = vset.pattern.permute.xlu1 %v2422_v48 }
 0x25a   :  { %v1469_v26 = vadd.f32 %v1453_v25, %v1356_v52  ;;  %1548 = vperm.xlu1 %2373, %v3000_v11   ;;  %v903_v52 = vmul.f32 %v3385_v32, %v807_v38  ;;  %v1755_v32 = vld [vmem:[%s3907_s5 + $0x8] sm:$0xff] }
 0x25c   :  { %v1537_v59 = vpop.permute.xlu1 %1536 }
 0x25d   :  { %v1566_v50 = vmul.f32 %v2021_v58, %v1537_v59  ;;  %v2426_v58 = vmov 0.0|0.0  }
 0x25e   :  { %2374 = vset.pattern.permute.xlu1 %v3917_v36  ;;  %v1940_v36 = vld [vmem:[%s3905_s3 + $0xd0] sm:$0xff]  ;;  %2245 = vmatprep.subr.bf16.mxu1 %v2426_v58 }
 0x25f   :  { %v1582_v40 = vadd.f32 %v1566_v50, %v1469_v26  ;;  %931 = vperm.xlu1 %2374, %v3005_v44   ;;  %v1972_v26 = vld [vmem:[%s3905_s3 + $0x1d0] sm:$0xff] }
 0x261   :  { %v1650_v39 = vpop.permute.xlu1 %1649 }
 0x262   :  { %v1679_v15 = vmul.f32 %v2037_v63, %v1650_v39  ;;  %v3552_v39 = vpop.permute.xlu0 %1044 }
 0x263   :  { %2378 = vset.pattern.permute.xlu1 %v2424_v18  ;;  %v1113_v18 = vmul.f32 %v1956_v13, %v3399_v49  ;;  %v1988_v49 = vld [vmem:[%s3905_s3 + $0x250] sm:$0xff] }
 0x264   :  { %v1695_v7 = vadd.f32 %v1679_v15, %v1582_v40  ;;  %1383 = vperm.xlu1 %2378, %v3005_v44  }
 0x266   :  { %v968_v0 = vpop.permute.xlu1 %967  ;;  %v3559_v13 = vpop.permute.xlu0 %1157 }
 0x267   :  { %v1000_v31 = vmul.f32 %v1940_v36, %v968_v0  ;;  %v2004_v36 = vld [vmem:[%s3905_s3 + $0x2d0] sm:$0xff] }
 0x268   :  { %2379 = vset.pattern.permute.xlu1 %v2422_v48  ;;  %v1754_v48 = vld [vmem:[%s3907_s5] sm:$0xff] }
 0x269   :  { %v1016_v25 = vadd.f32 %v1000_v31, %v903_v52  ;;  %1496 = vperm.xlu1 %2379, %v3005_v44   ;;  %v2246_v63 = vpack.c.bf16 %v1755_v32, %v1754_v48  ;;  %v1943_v48 = vld [vmem:[%s3905_s3 + $0xe8] sm:$0xff] }
 0x26b   :  { %v1129_v59 = vadd.f32 %v1113_v18, %v1016_v25  ;;  %v1194_v50 = vpop.permute.xlu1 %1193  ;;  %2247 = vmatpush3.bf16.msra.mxu1 %v2246_v63  ;;  %v3566_v25 = vpop.permute.xlu0 %1270 }
 0x26c   :  { %v1226_v40 = vmul.f32 %v1972_v26, %v1194_v50  ;;  %2248 = vmatprep.subr.bf16.mxu1 %v2426_v58 }
 0x26d   :  { %2383 = vset.pattern.permute.xlu1 %v2421_v12 }
 0x26e   :  { %v1242_v44 = vadd.f32 %v1226_v40, %v1129_v59  ;;  %1040 = vperm.xlu1 %2383, %v3010_v29  }
 0x26f   :  { %v3573_v40 = vpop.permute.xlu0 %1609 }
 0x270   :  { %v1307_v15 = vpop.permute.xlu1 %1306 }
 0x271   :  { %v1339_v12 = vmul.f32 %v1988_v49, %v1307_v15  ;;  %v1003_v49 = vmul.f32 %v1943_v48, %v3410_v6 }
 0x272   :  { %2384 = vset.pattern.permute.xlu1 %v2420_v61  ;;  %v2020_v61 = vld [vmem:[%s3905_s3 + $0x350] sm:$0xff] }
 0x273   :  { %v1355_v38 = vadd.f32 %v1339_v12, %v1242_v44  ;;  %1153 = vperm.xlu1 %2384, %v3010_v29   ;;  %v3587_v12 = vpop.permute.xlu0 %815 }
 0x275   :  { %v1420_v0 = vpop.permute.xlu1 %1419 }
 0x276   :  { %v1452_v52 = vmul.f32 %v2004_v36, %v1420_v0  ;;  %v1959_v36 = vld [vmem:[%s3905_s3 + $0x168] sm:$0xff] }
 0x277   :  { %2385 = vset.pattern.permute.xlu1 %v2423_v42  ;;  %v2036_v42 = vld [vmem:[%s3905_s3 + $0x3d0] sm:$0xff] }
 0x278   :  { %v1468_v31 = vadd.f32 %v1452_v52, %v1355_v38  ;;  %1266 = vperm.xlu1 %2385, %v3010_v29  }
 0x27a   :  { %v1533_v18 = vpop.permute.xlu1 %1532 }
 0x27b   :  { %v1565_v26 = vmul.f32 %v2020_v61, %v1533_v18 }
 0x27c   :  { %2386 = vset.pattern.permute.xlu1 %v2425_v47  ;;  %v810_v47 = vld [vmem:[%s3905_s3 + $0x68] sm:$0xff] }
 0x27d   :  { %v1581_v58 = vadd.f32 %v1565_v26, %v1468_v31  ;;  %1625 = vperm.xlu1 %2386, %v2906_v10  }
 0x27f   :  { %v1646_v59 = vpop.permute.xlu1 %1645 }
 0x280   :  { %v1678_v50 = vmul.f32 %v2036_v42, %v1646_v59  ;;  %v2023_v42 = vld [vmem:[%s3905_s3 + $0x368] sm:$0xff] }
 0x281   :  { %1605 = vperm.xlu1 %2386, %v3010_v29   ;;  %v1727_v29 = vsel %vm1700_vm2, %v1695_v7, 0.0  ;;  %v1991_v7 = vld [vmem:[%s3905_s3 + $0x268] sm:$0xff] }
 0x282   :  { %v1694_v32 = vadd.f32 %v1678_v50, %v1581_v58  ;;  %v1342_v26 = vmul.f32 %v1991_v7, %v3419_v1  ;;  %v1942_v1 = vld [vmem:[%s3905_s3 + $0xe0] sm:$0xff] }
 0x284   :  { %v1725_v10 = vsel %vm1700_vm2, %v1694_v32, 0.0  ;;  %v881_v44 = vpop.permute.xlu1 %880  ;;  %v1568_v32 = vmul.f32 %v2023_v42, %v3433_v46 }
 0x285   :  { %v1726_v63 = vadd.f32 %v1725_v10, %v3484_v43  ;;  %v906_v15 = vmul.f32 %v881_v44, %v810_v47  ;;  %1661 = vperm.xlu1 %2386, %v3000_v11   ;;  %v1975_v11 = vld [vmem:[%s3905_s3 + $0x1e8] sm:$0xff]  ;;  %v3598_v43 = vpop.permute.xlu0 %927 }
 0x287   :  { %v1019_v38 = vadd.f32 %v1003_v49, %v906_v15  ;;  %v3592_v0 = vadd.f32 %v1727_v29, %v1726_v63  ;;  %v1756_v49 = vld [vmem:[%s3907_s5 + $0x10] sm:$0xff]  ;;  %v1757_v63 = vld [vmem:[%s3907_s5 + $0x18] sm:$0xff]  ;;  %v809_v15 = vld [vmem:[%s3905_s3 + $0x60] sm:$0xff] }
 0x288   :  { %v2249_v29 = vpack.c.bf16 %v1757_v63, %v1756_v49 }
 0x289   :  { %v1093_v52 = vpop.permute.xlu1 %1092  ;;  %1629 = vperm.xlu1 %2386, %v2934_v57   ;;  %v2007_v57 = vld [vmem:[%s3905_s3 + $0x2e8] sm:$0xff]  ;;  %v3611_v59 = vpop.permute.xlu0 %1379 }
 0x28a   :  { %v1116_v6 = vmul.f32 %v1959_v36, %v1093_v52  ;;  %v1958_v36 = vld [vmem:[%s3905_s3 + $0x160] sm:$0xff]  ;;  %2250 = vmatpush3.bf16.msra.mxu1 %v2249_v29  ;;  %v905_v52 = vmul.f32 %v3448_v24, %v809_v15 }
 0x28b   :  { %v2006_v24 = vld [vmem:[%s3905_s3 + $0x2e0] sm:$0xff] }
 0x28c   :  { %v1132_v31 = vadd.f32 %v1116_v6, %v1019_v38  ;;  %v1974_v6 = vld [vmem:[%s3905_s3 + $0x1e0] sm:$0xff] }
 0x28d   :  { %1633 = vperm.xlu1 %2386, %v2929_v3   ;;  %v3626_v46 = vpop.permute.xlu0 %1492 }
 0x28e   :  { %v1206_v61 = vpop.permute.xlu1 %1205 }
 0x28f   :  { %v1229_v18 = vmul.f32 %v1975_v11, %v1206_v61  ;;  %v1990_v61 = vld [vmem:[%s3905_s3 + $0x260] sm:$0xff] }
 0x290   :  { %v1341_v42 = vmul.f32 %v1990_v61, %v3475_v9 }
 0x291   :  { %v1245_v58 = vadd.f32 %v1229_v18, %v1132_v31  ;;  %v3638_v18 = vpop.permute.xlu0 %1520 }
 0x293   :  { %v1358_v3 = vadd.f32 %v1342_v26, %v1245_v58  ;;  %v1432_v50 = vpop.permute.xlu1 %1431  ;;  %v2428_v26 = vmov 0.0   ;;  %v1228_v58 = vmul.f32 %v1974_v6, %v3459_v51  ;;  %v812_v6 = vld [vmem:[%s3905_s3 + $0x78] sm:$0xff] }
 0x294   :  { %v1455_v48 = vmul.f32 %v2007_v57, %v1432_v50  ;;  %2234 = vmatprep.mubr.msk.f32.mxu1 %vm2427_vm3, %v2428_v26 }
 0x295   :  { %v1658_v51 = vpop.permute.xlu0 %1657 }
 0x296   :  { %v1471_v47 = vadd.f32 %v1455_v48, %v1358_v3  ;;  %v2022_v48 = vld [vmem:[%s3905_s3 + $0x360] sm:$0xff] }
 0x297   :  { %v1567_v49 = vmul.f32 %v2022_v48, %v3487_v34 }
 0x298   :  { %v1584_v10 = vadd.f32 %v1568_v32, %v1471_v47  ;;  %v976_v44 = vpop.permute.xlu1 %975 }
 0x299   :  { %v1002_v38 = vmul.f32 %v1942_v1, %v976_v44  ;;  %v2039_v1 = vld [vmem:[%s3905_s3 + $0x3e8] sm:$0xff]  ;;  %v2038_v44 = vld [vmem:[%s3905_s3 + $0x3e0] sm:$0xff] }
 0x29a   :  { %v1681_v15 = vmul.f32 %v2039_v1, %v1658_v51 }
 0x29b   :  { %v1018_v11 = vadd.f32 %v1002_v38, %v905_v52 }
 0x29d   :  { %v1089_v31 = vpop.permute.xlu1 %1088 }
 0x29e   :  { %v1115_v7 = vmul.f32 %v1958_v36, %v1089_v31  ;;  %v1697_v36 = vadd.f32 %v1681_v15, %v1584_v10  ;;  %v1961_v10 = vld [vmem:[%s3905_s3 + $0x178] sm:$0xff] }
 0x2a0   :  { %v1131_v57 = vadd.f32 %v1115_v7, %v1018_v11  ;;  %v1945_v7 = vld [vmem:[%s3905_s3 + $0xf8] sm:$0xff]  ;;  %v1731_v26 = vsel %vm1700_vm2, %v1697_v36, 0.0  ;;  %v1931_v36 = vld [vmem:[%s3905_s3 + $0x88] sm:$0xff] }
 0x2a2   :  { %v1244_v3 = vadd.f32 %v1228_v58, %v1131_v57  ;;  %v1428_v50 = vpop.permute.xlu1 %1427  ;;  %v1005_v57 = vmul.f32 %v1945_v7, %v3498_v54  ;;  %v1947_v7 = vld [vmem:[%s3905_s3 + $0x108] sm:$0xff] }
 0x2a3   :  { %v1454_v32 = vmul.f32 %v2006_v24, %v1428_v50  ;;  %v1977_v24 = vld [vmem:[%s3905_s3 + $0x1f8] sm:$0xff] }
 0x2a4   :  { %v1357_v47 = vadd.f32 %v1341_v42, %v1244_v3 }
 0x2a6   :  { %v1470_v9 = vadd.f32 %v1454_v32, %v1357_v47  ;;  %v1993_v32 = vld [vmem:[%s3905_s3 + $0x278] sm:$0xff] }
 0x2a7   :  { %v1654_v63 = vpop.permute.xlu1 %1653 }
 0x2a8   :  { %v1583_v29 = vadd.f32 %v1567_v49, %v1470_v9  ;;  %v1680_v38 = vmul.f32 %v2038_v44, %v1654_v63 }
 0x2aa   :  { %v1696_v52 = vadd.f32 %v1680_v38, %v1583_v29 }
 0x2ac   :  { %v1729_v31 = vsel %vm1700_vm2, %v1696_v52, 0.0  ;;  %v891_v11 = vpop.permute.xlu1 %890 }
 0x2ad   :  { %v1730_v34 = vadd.f32 %v1729_v31, %v3592_v0  ;;  %v908_v61 = vmul.f32 %v891_v11, %v812_v6  ;;  %v1231_v0 = vmul.f32 %v1977_v24, %v3505_v37  ;;  %v798_v6 = vld [vmem:[%s3905_s3 + $0x8] sm:$0xff]  ;;  %v1930_v24 = vld [vmem:[%s3905_s3 + $0x80] sm:$0xff] }
 0x2ae   :  { %v894_v11 = vmul.f32 %v3535_v41, %v798_v6  ;;  %v1963_v41 = vld [vmem:[%s3905_s3 + $0x188] sm:$0xff] }
 0x2af   :  { %v3667_v58 = vadd.f32 %v1731_v26, %v1730_v34  ;;  %v1021_v3 = vadd.f32 %v1005_v57, %v908_v61  ;;  %v1104_v26 = vmul.f32 %v1947_v7, %v3552_v39  ;;  %v800_v57 = vld [vmem:[%s3905_s3 + $0x18] sm:$0xff] }
 0x2b0   :  { %v1949_v39 = vld [vmem:[%s3905_s3 + $0x118] sm:$0xff] }
 0x2b1   :  { %v1101_v42 = vpop.permute.xlu1 %1100 }
 0x2b2   :  { %v1118_v50 = vmul.f32 %v1961_v10, %v1101_v42  ;;  %v1933_v10 = vld [vmem:[%s3905_s3 + $0x98] sm:$0xff] }
 0x2b4   :  { %v1134_v48 = vadd.f32 %v1118_v50, %v1021_v3  ;;  %v993_v50 = vmul.f32 %v1933_v10, %v3092_v17  ;;  %v1979_v17 = vld [vmem:[%s3905_s3 + $0x208] sm:$0xff] }
 0x2b6   :  { %v1247_v47 = vadd.f32 %v1231_v0, %v1134_v48  ;;  %v1327_v1 = vpop.permute.xlu1 %1326  ;;  %v896_v0 = vmul.f32 %v3094_v21, %v800_v57  ;;  %v1217_v48 = vmul.f32 %v1963_v41, %v3559_v13  ;;  %v990_v21 = vmul.f32 %v1930_v24, %v3598_v43 }
 0x2b7   :  { %v1344_v51 = vmul.f32 %v1993_v32, %v1327_v1  ;;  %v797_v32 = vld [vmem:[%s3905_s3] sm:$0xff]  ;;  %v1965_v1 = vld [vmem:[%s3905_s3 + $0x198] sm:$0xff]  ;;  %v1106_v13 = vmul.f32 %v1949_v39, %v3100_v35  ;;  %v1330_v43 = vmul.f32 %v1979_v17, %v3566_v25  ;;  %v1944_v35 = vld [vmem:[%s3905_s3 + $0xf0] sm:$0xff] }
 0x2b8   :  { %v893_v6 = vmul.f32 %v3587_v12, %v797_v32  ;;  %v1009_v7 = vadd.f32 %v993_v50, %v896_v0  ;;  %v1995_v12 = vld [vmem:[%s3905_s3 + $0x288] sm:$0xff]  ;;  %v1960_v25 = vld [vmem:[%s3905_s3 + $0x170] sm:$0xff]  ;;  %v2013_v39 = vld [vmem:[%s3905_s3 + $0x318] sm:$0xff] }
 0x2b9   :  { %v3677_v44 = vadd.f32 %v1344_v51, %v1247_v47  ;;  %v1946_v47 = vld [vmem:[%s3905_s3 + $0x100] sm:$0xff] }
 0x2ba   :  { %v1006_v10 = vadd.f32 %v990_v21, %v893_v6  ;;  %v1122_v41 = vadd.f32 %v1106_v13, %v1009_v7  ;;  %v2009_v13 = vld [vmem:[%s3905_s3 + $0x2f8] sm:$0xff]  ;;  %v1558_v6 = vmul.f32 %v2013_v39, %v3132_v28  ;;  %v1968_v28 = vld [vmem:[%s3905_s3 + $0x1b0] sm:$0xff] }
 0x2bb   :  { %v3679_v54 = vpop.permute.xlu1 %1439 }
 0x2c0   :  { %v984_v49 = vpop.permute.xlu1 %983 }
 0x2c1   :  { %v1004_v50 = vmul.f32 %v1944_v35, %v984_v49  ;;  %v1994_v49 = vld [vmem:[%s3905_s3 + $0x280] sm:$0xff]  ;;  %v2028_v35 = vld [vmem:[%s3905_s3 + $0x390] sm:$0xff] }
 0x2c2   :  { %v1670_v39 = vmul.f32 %v2028_v35, %v3203_v30 }
 0x2c5   :  { %v3681_v9 = vpop.permute.xlu1 %1096 }
 0x2ca   :  { %v3683_v63 = vpop.permute.xlu1 %1209 }
 0x2cf   :  { %v3685_v15 = vpop.permute.xlu1 %1322 }
 0x2d4   :  { %v3687_v37 = vpop.permute.xlu1 %1435 }
 0x2d9   :  { %v3689_v29 = vpop.permute.xlu1 %1548 }
 0x2de   :  { %v932_v38 = vpop.permute.xlu1 %931 }
 0x2df   :  { %v991_v31 = vmul.f32 %v1931_v36, %v932_v38  ;;  %v1962_v38 = vld [vmem:[%s3905_s3 + $0x180] sm:$0xff]  ;;  %v1981_v36 = vld [vmem:[%s3905_s3 + $0x218] sm:$0xff] }
 0x2e0   :  { %v1332_v24 = vmul.f32 %v1981_v36, %v3116_v60  ;;  %v2011_v60 = vld [vmem:[%s3905_s3 + $0x308] sm:$0xff] }
 0x2e1   :  { %v1007_v61 = vadd.f32 %v991_v31, %v894_v11 }
 0x2e3   :  { %v1384_v52 = vpop.permute.xlu1 %1383  ;;  %v1120_v42 = vadd.f32 %v1104_v26, %v1007_v61  ;;  %v1219_v61 = vmul.f32 %v1965_v1, %v3108_v53  ;;  %v1997_v26 = vld [vmem:[%s3905_s3 + $0x298] sm:$0xff]  ;;  %v811_v53 = vld [vmem:[%s3905_s3 + $0x70] sm:$0xff] }
 0x2e4   :  { %v1445_v32 = vmul.f32 %v1997_v26, %v3124_v27  ;;  %v1443_v1 = vmul.f32 %v1995_v12, %v1384_v52  ;;  %v907_v21 = vmul.f32 %v3519_v4, %v811_v53  ;;  %v2029_v52 = vld [vmem:[%s3905_s3 + $0x398] sm:$0xff]  ;;  %v1992_v4 = vld [vmem:[%s3905_s3 + $0x270] sm:$0xff]  ;;  %v1442_v26 = vmul.f32 %v1994_v49, %v3611_v59  ;;  %v2014_v12 = vld [vmem:[%s3905_s3 + $0x320] sm:$0xff] }
 0x2e5   :  { %v1233_v51 = vadd.f32 %v1217_v48, %v1120_v42  ;;  %v1235_v48 = vadd.f32 %v1219_v61, %v1122_v41  ;;  %v2010_v59 = vld [vmem:[%s3905_s3 + $0x300] sm:$0xff] }
 0x2e6   :  { %v1020_v7 = vadd.f32 %v1004_v50, %v907_v21  ;;  %v1222_v50 = vmul.f32 %v1968_v28, %v3360_v2  ;;  %v1555_v2 = vmul.f32 %v2010_v59, %v3626_v46  ;;  %v2041_v46 = vld [vmem:[%s3905_s3 + $0x3f8] sm:$0xff] }
 0x2e7   :  { %v1346_v42 = vadd.f32 %v1330_v43, %v1233_v51  ;;  %v1117_v51 = vmul.f32 %v1960_v25, %v3681_v9  ;;  %v1348_v36 = vadd.f32 %v1332_v24, %v1235_v48  ;;  %v2024_v25 = vld [vmem:[%s3905_s3 + $0x370] sm:$0xff]  ;;  %v2026_v48 = vld [vmem:[%s3905_s3 + $0x380] sm:$0xff] }
 0x2e8   :  { %v1497_v34 = vpop.permute.xlu1 %1496 }
 0x2e9   :  { %v1461_v9 = vadd.f32 %v1445_v32, %v1348_v36  ;;  %v1133_v41 = vadd.f32 %v1117_v51, %v1020_v7  ;;  %v1559_v32 = vmul.f32 %v2014_v12, %v3287_v45  ;;  %v1569_v45 = vmul.f32 %v2024_v25, %v3689_v29  ;;  %v2016_v51 = vld [vmem:[%s3905_s3 + $0x330] sm:$0xff] }
 0x2eb   :  { %v1574_v53 = vadd.f32 %v1558_v6, %v1461_v9  ;;  %v1238_v6 = vadd.f32 %v1222_v50, %v3358_v19 }
 0x2ed   :  { %v1041_v3 = vpop.permute.xlu1 %1040 }
 0x2ee   :  { %v1103_v31 = vmul.f32 %v1946_v47, %v1041_v3  ;;  %v1978_v3 = vld [vmem:[%s3905_s3 + $0x200] sm:$0xff]  ;;  %v1976_v47 = vld [vmem:[%s3905_s3 + $0x1f0] sm:$0xff] }
 0x2ef   :  { %v1230_v61 = vmul.f32 %v1976_v47, %v3683_v63  ;;  %v1671_v63 = vmul.f32 %v2029_v52, %v3140_v56  ;;  %v1984_v56 = vld [vmem:[%s3905_s3 + $0x230] sm:$0xff] }
 0x2f0   :  { %v1119_v0 = vadd.f32 %v1103_v31, %v1006_v10  ;;  %v1459_v31 = vadd.f32 %v1443_v1, %v1346_v42  ;;  %v1457_v10 = vmul.f32 %v2009_v13, %v3679_v54  ;;  %v1343_v54 = vmul.f32 %v1992_v4, %v3685_v15  ;;  %v2025_v15 = vld [vmem:[%s3905_s3 + $0x378] sm:$0xff]  ;;  %v2000_v47 = vld [vmem:[%s3905_s3 + $0x2b0] sm:$0xff]  ;;  %v2031_v4 = vld [vmem:[%s3905_s3 + $0x3a8] sm:$0xff] }
 0x2f1   :  { %v1335_v21 = vmul.f32 %v1984_v56, %v3366_v14  ;;  %v1686_v14 = vadd.f32 %v1670_v39, %v3201_v20  ;;  %v1448_v29 = vmul.f32 %v2000_v47, %v3372_v23  ;;  %v2001_v20 = vld [vmem:[%s3905_s3 + $0x2b8] sm:$0xff]  ;;  %v1561_v23 = vmul.f32 %v2016_v51, %v3378_v5  ;;  %v2032_v5 = vld [vmem:[%s3905_s3 + $0x3b0] sm:$0xff] }
 0x2f2   :  { %v1154_v11 = vpop.permute.xlu1 %1153  ;;  %v1473_v1 = vadd.f32 %v1457_v10, %v3677_v44  ;;  %v1666_v44 = vpop.permute.xlu0 %1665  ;;  %v1449_v59 = vmul.f32 %v2001_v20, %v3334_v16  ;;  %v2033_v16 = vld [vmem:[%s3905_s3 + $0x3b8] sm:$0xff] }
 0x2f3   :  { %v1216_v57 = vmul.f32 %v1962_v38, %v1154_v11  ;;  %v1556_v11 = vmul.f32 %v2011_v60, %v1497_v34  ;;  %v2008_v34 = vld [vmem:[%s3905_s3 + $0x2f0] sm:$0xff]  ;;  %v1246_v60 = vadd.f32 %v1230_v61, %v1133_v41  ;;  %v1351_v19 = vadd.f32 %v1335_v21, %v1238_v6 }
 0x2f5   :  { %v1232_v38 = vadd.f32 %v1216_v57, %v1119_v0  ;;  %v2027_v57 = vld [vmem:[%s3905_s3 + $0x388] sm:$0xff]  ;;  %v1572_v42 = vadd.f32 %v1556_v11, %v1459_v31  ;;  %v1456_v0 = vmul.f32 %v2008_v34, %v3687_v37  ;;  %v2030_v37 = vld [vmem:[%s3905_s3 + $0x3a0] sm:$0xff]  ;;  %v1359_v49 = vadd.f32 %v1343_v54, %v1246_v60 }
 0x2f6   :  { %v1669_v30 = vmul.f32 %v2027_v57, %v3573_v40  ;;  %v1570_v40 = vmul.f32 %v2025_v15, %v3512_v22  ;;  %v2040_v22 = vld [vmem:[%s3905_s3 + $0x3f0] sm:$0xff]  ;;  %v1575_v31 = vadd.f32 %v1559_v32, %v3289_v55  ;;  %v1672_v11 = vmul.f32 %v2030_v37, %v3297_v62 }
 0x2f7   :  { %v1267_v17 = vpop.permute.xlu1 %1266  ;;  %v1472_v52 = vadd.f32 %v1456_v0, %v1359_v49  ;;  %v1704_v62 = vsel %vm1700_vm2, %v1686_v14, 0.0  ;;  %v1464_v34 = vadd.f32 %v1448_v29, %v1351_v19  ;;  %v2043_v19 = vld [vmem:[%s3908_s6] ss:$0 sm:$0xff] }
 0x2f8   :  { %v1329_v27 = vmul.f32 %v1978_v3, %v1267_v17  ;;  %v1687_v17 = vadd.f32 %v1671_v63, %v1574_v53  ;;  %v1586_v7 = vadd.f32 %v1570_v40, %v1473_v1  ;;  %v2017_v63 = vld [vmem:[%s3905_s3 + $0x338] sm:$0xff]  ;;  %v1688_v57 = vadd.f32 %v1672_v11, %v1575_v31 }
 0x2f9   :  { %v1585_v9 = vadd.f32 %v1569_v45, %v1472_v52  ;;  %v1577_v53 = vadd.f32 %v1561_v23, %v1464_v34 }
 0x2fa   :  { %v1345_v43 = vadd.f32 %v1329_v27, %v1232_v38  ;;  %v1685_v38 = vadd.f32 %v1669_v30, %v1572_v42  ;;  %v1562_v42 = vmul.f32 %v2017_v63, %v3638_v18  ;;  %v1708_v0 = vsel %vm1700_vm2, %v1688_v57, 0.0 }
 0x2fc   :  { %v1626_v24 = vpop.permute.xlu1 %1625  ;;  %v1458_v3 = vadd.f32 %v1442_v26, %v1345_v43  ;;  %v1683_v43 = vmul.f32 %v2041_v46, %v1666_v44  ;;  %v1702_v26 = vsel %vm1700_vm2, %v1685_v38, 0.0 }
 0x2fd   :  { %v1673_v28 = vmul.f32 %v2031_v4, %v1626_v24  ;;  %v1706_v24 = vsel %vm1700_vm2, %v1687_v17, 0.0 }
 0x2fe   :  { %v1571_v27 = vadd.f32 %v1555_v2, %v1458_v3  ;;  %v1699_v41 = vadd.f32 %v1683_v43, %v1586_v7 }
 0x2ff   :  { %v1689_v3 = vadd.f32 %v1673_v28, %v3269_v33 }
 0x300   :  { %v1606_v13 = vpop.permute.xlu1 %1605  ;;  %v1735_v32 = vsel %vm1700_vm2, %v1699_v41, 0.0 }
 0x301   :  { %v1668_v36 = vmul.f32 %v2026_v48, %v1606_v13  ;;  %v1465_v48 = vadd.f32 %v1449_v59, %v3338_v8  ;;  %v1710_v1 = vsel %vm1700_vm2, %v1689_v3, 0.0 }
 0x303   :  { %v1684_v61 = vadd.f32 %v1668_v36, %v1571_v27  ;;  %v1578_v2 = vadd.f32 %v1562_v42, %v1465_v48  ;;  %v2042_v36 = vld [vmem:[%s3906_s4] ss:$0 sm:$0xff]  ;;  %s2429_s4 = smov [#allocation2]  }
 0x304   :  { %v1662_v35 = vpop.permute.xlu1 %1661  ;;  %s1856_s1 = sshll.u32 %s2429_s4, 4  ;;  %s1857_s1 = int_to_ptr.vmem [resolvable:$true] %s1856_s1 }
 0x305   :  { %v1701_v10 = vsel %vm1700_vm2, %v1684_v61, 0.0  ;;  %v1682_v55 = vmul.f32 %v2040_v22, %v1662_v35  ;;  %s2394_s21 = scalar_lea.vmem %s1857_s1, 32  ;;  %p2399_p1 = scmp.lt.s32.totalorder %s1857_s1, %s1857_s1 }
 0x306   :  { %v1703_v12 = vadd.f32 %v1702_v26, %v1701_v10  ;;  %p2395_p0 = scmp.ne.s32.totalorder %s1857_s1, %s2394_s21  ;;  %p2400_p2 = scmp.lt.s32.totalorder %s2394_s21, %s2394_s21 }
 0x307   :  { %v1698_v54 = vadd.f32 %v1682_v55, %v1585_v9 }
 0x308   :  { %v1705_v56 = vadd.f32 %v1704_v62, %v1703_v12  ;;  %v1630_v25 = vpop.permute.xlu1 %1629  ;;  %p2401_p3 = por %p2400_p2, %p2399_p1 }
 0x309   :  { %v1733_v39 = vsel %vm1700_vm2, %v1698_v54, 0.0  ;;  %v1674_v50 = vmul.f32 %v2032_v5, %v1630_v25 }
 0x30a   :  { %v1707_v15 = vadd.f32 %v1706_v24, %v1705_v56  ;;  %v1734_v60 = vadd.f32 %v1733_v39, %v3667_v58  ;;  %p2402_p4 = pnand %p2401_p3, %p2395_p0 }
 0x30b   :  { %v1690_v47 = vadd.f32 %v1674_v50, %v1577_v53 }
 0x30c   :  { %v1736_v18 = vadd.f32 %v1735_v32, %v1734_v60  ;;  %v1709_v30 = vadd.f32 %v1708_v0, %v1707_v15  ;;  %v1634_v33 = vpop.permute.xlu1 %1633 }
 0x30d   :  { %v1675_v17 = vmul.f32 %v2033_v16, %v1634_v33  ;;  %v1712_v21 = vsel %vm1700_vm2, %v1690_v47, 0.0 }
 0x30e   :  { %v1737_v37 = vrot.slane %v1736_v18, 4  ;;  %v1711_v58 = vadd.f32 %v1710_v1, %v1709_v30 }
 0x30f   :  { %v1691_v49 = vadd.f32 %v1675_v17, %v1578_v2 }
 0x310   :  { %v1738_v45 = vadd.f32 %v1737_v37, %v1736_v18  ;;  %v1713_v13 = vadd.f32 %v1712_v21, %v1711_v58 }
 0x311   :  { %v1714_v51 = vsel %vm1700_vm2, %v1691_v49, 0.0 }
 0x312   :  { %v1739_v8 = vrot.slane %v1738_v45, 2  ;;  %v1715_v40 = vadd.f32 %v1714_v51, %v1713_v13 }
 0x314   :  { %v1740_v46 = vadd.f32 %v1739_v8, %v1738_v45  ;;  %v1716_v44 = vrot.slane %v1715_v40, 4 }
 0x316   :  { %v1741_v38 = vrot.slane %v1740_v46, 1  ;;  %v1717_v27 = vadd.f32 %v1716_v44, %v1715_v40 }
 0x318   :  { %v1742_v14 = vadd.f32 %v1741_v38, %v1740_v46  ;;  %v1718_v6 = vrot.slane %v1717_v27, 2 }
 0x31a   :  { %v1719_v29 = vadd.f32 %v1718_v6, %v1717_v27  ;;  %v1751_v52 = vadd.f32 %v2042_v36, %v1742_v14 }
 0x31c   :  { %v1720_v4 = vrot.slane %v1719_v29, 1  ;;  %v1753_v31 = vmax.f32 %v1751_v52, 0.0 }
 0x31e   :  { %v1721_v22 = vadd.f32 %v1720_v4, %v1719_v29  ;;  %v1767_v61 = vrot.slane %v1753_v31, 7 }
 0x320   :  { %v1750_v11 = vadd.f32 %v2042_v36, %v1721_v22 }
 0x322   :  { %v1752_v7 = vmax.f32 %v1750_v11, 0.0 }
 0x324   :  { %v1769_v20 = vsel %vm1768_vm4, %v1767_v61, %v1752_v7 }
 0x325   :  { %2235 = vmatmul.mubr.msk.f32.vlgmr.msra.gmra.mrb[30].mxu1 %vm1700_vm2, %v1769_v20 }
 0x3f8   :  { %v1838_v23 = vpop.f32.mrb[30].mxu1 }
 0x3f9   :  { %v1839_v43 = vadd.f32 %v2043_v19, %v1838_v23  ;;  %v2236_v9 = vpop.f32.mrb[31].mxu1 }
 0x3fb   :  { %v2045_v35 = vmul.f32 -1.442695, %v1839_v43 }
 0x3fd   :  { %2390 = vpow2.f32 %v2045_v35 }
 0x407   :  { %v2391_v28 = vpop.eup %2390 }
 0x408   :  { %v1845_v26 = vadd.f32 1.0, %v2391_v28 }
 0x40a   :  { %2392 = vrcp.f32 %v1845_v26 }
 0x414   :  { %v2393_v10 = vpop.eup %2392 }
 0x415   :  { %1849 = vst.msk [vmem:[#allocation2] sm:$0x3] %vm1848_vm5, %v2393_v10 }
 0x416   :  { %2405 = shalt.err (!%p2402_p4)
}
 0x417   :  { %s2406_s23 = scalar_lea.hbm %s3909_s7, 32 }
 0x418   :  { %p2407_p5 = scmp.ne.s32.totalorder %s3909_s7, %s2406_s23  ;;  %p2410_p6 = scmp.lt.u32.totalorder %s2406_s23, %s3909_s7 }
 0x41a   :  { %p2412_p7 = pnand %p2410_p6, %p2407_p5 }
 0x41c   :  { %2415 = shalt.err (!%p2412_p7)
}
 0x41d   :  { %1859 = dma.vmem_to_hbm [thread:$0]  %s1857_s1, 32, %s3909_s7, [#allocation3]  }
 0x41e   :  { %2416 = dma.done.wait [#allocation3], 32  }
 0x41f   :  { %2417 = vsyncadd [#allocation3], 4294967264 }
 0x420   :  { %1863 = vsyncpa [#allocation3], 1 }

</bundles_post_ra>
